<compile_context>
chip_gen: v7x
topology: tpu7x:2x2x1
jax: 0.10.0
libtpu: 0.0.40
codegen_flags: <defaults>
</compile_context>

<pallas_src>
import math

import jax
import jax.numpy as jnp
import numpy as np
from jax.experimental import pallas as pl
from jax.experimental.pallas import tpu as pltpu

# ----------------------------- model hyper-params ---------------------------
B = 2            # batch
N = 8            # sequence length (tokens)
C = 32           # embedding dim
NUM_HEADS = 4
HEAD_DIM = C // NUM_HEADS
MLP_RATIO = 2
H = C * MLP_RATIO
LN_EPS = 1e-5
SCALE = HEAD_DIM ** (-0.5)
BN = B * N
NEG_BIG = -1e30  # additive mask value for cross-batch attention


# ----------------------------- in-kernel math helpers ------------------------
def _erf(x):
    # Abramowitz & Stegun 7.1.26 rational approximation (|error| < 1.6e-7).
    a1, a2, a3, a4, a5 = 0.254829592, -0.284496736, 1.421413741, -1.453152027, 1.061405429
    p = 0.3275911
    sign = jnp.where(x >= 0.0, 1.0, -1.0)
    ax = jnp.abs(x)
    t = 1.0 / (1.0 + p * ax)
    poly = ((((a5 * t + a4) * t + a3) * t + a2) * t + a1) * t
    return sign * (1.0 - poly * jnp.exp(-ax * ax))


def _gelu_exact(x):
    return 0.5 * x * (1.0 + _erf(x * (1.0 / math.sqrt(2.0))))


def _layernorm(x, gamma, beta):
    mu = jnp.mean(x, axis=-1, keepdims=True)
    var = jnp.mean((x - mu) * (x - mu), axis=-1, keepdims=True)
    return (x - mu) * jax.lax.rsqrt(var + LN_EPS) * gamma + beta


def _softmax(x):
    m = jnp.max(x, axis=-1, keepdims=True)
    e = jnp.exp(x - m)
    return e / jnp.sum(e, axis=-1, keepdims=True)


# ----------------------------- the Pallas kernel -----------------------------
def block_kernel(x_ref,          # (BN, C)  flattened tokens
                 wqkv_ref,       # (3, NUM_HEADS, C, HEAD_DIM)
                 wproj_ref,      # (NUM_HEADS, HEAD_DIM, C)
                 w1_ref,         # (C, H)
                 w2_ref,         # (H, C)
                 vec_ref,        # (6, C): ln1g, ln1b, ln2g, ln2b, bproj, b2
                 b1_ref,         # (1, H)
                 bias_ref,       # (BN, BN) block-diagonal batch mask (0 / -1e30)
                 o_ref):         # (BN, C)
    x = x_ref[...]                                       # (BN, C)

    ln1g, ln1b = vec_ref[0:1, :], vec_ref[1:2, :]
    ln2g, ln2b = vec_ref[2:3, :], vec_ref[3:4, :]
    bproj, b2 = vec_ref[4:5, :], vec_ref[5:6, :]
    b1 = b1_ref[...]                                     # (1, H)
    bias = bias_ref[...]                                 # (BN, BN)

    # ---- attention branch: attn(norm1(x)) over all batches at once ----
    xn = _layernorm(x, ln1g, ln1b)                       # (BN, C)

    attn_out = None
    for h in range(NUM_HEADS):                           # static 4-way unroll
        qh = jnp.dot(xn, wqkv_ref[0, h], preferred_element_type=jnp.float32)  # (BN, hd)
        kh = jnp.dot(xn, wqkv_ref[1, h], preferred_element_type=jnp.float32)  # (BN, hd)
        vh = jnp.dot(xn, wqkv_ref[2, h], preferred_element_type=jnp.float32)  # (BN, hd)
        # scores = q @ k^T (contract on head_dim), block-diagonal batch mask
        s = jax.lax.dot_general(qh, kh, (((1,), (1,)), ((), ())),
                                preferred_element_type=jnp.float32)            # (BN, BN)
        a = _softmax(s * SCALE + bias)
        ho = jnp.dot(a, vh, preferred_element_type=jnp.float32)                # (BN, hd)
        # fold the head directly through its slice of the projection weight
        contrib = jnp.dot(ho, wproj_ref[h], preferred_element_type=jnp.float32)  # (BN, C)
        attn_out = contrib if attn_out is None else attn_out + contrib

    x1 = x + attn_out + bproj                            # residual 1

    # ---- MLP branch: mlp(norm2(x1)) ----
    x2n = _layernorm(x1, ln2g, ln2b)
    hdn = jnp.dot(x2n, w1_ref[...], preferred_element_type=jnp.float32) + b1   # (BN, H)
    hdn = _gelu_exact(hdn)
    mlp_out = jnp.dot(hdn, w2_ref[...], preferred_element_type=jnp.float32) + b2

    o_ref[...] = x1 + mlp_out                            # residual 2


# ----------------------------- host-side packing + wrapper -------------------
def _pack_params(params):
    (ln1g, ln1b, wqkv, wproj, bproj, ln2g, ln2b, w1, b1, w2, b2) = params
    wq, wk, wv = wqkv[:, :C], wqkv[:, C:2 * C], wqkv[:, 2 * C:]
    # (C, C) -> (NUM_HEADS, C, HEAD_DIM): head h owns output columns [h*hd, (h+1)*hd)
    per_head = lambda w: w.reshape(C, NUM_HEADS, HEAD_DIM).transpose(1, 0, 2)
    wqkv_heads = jnp.stack([per_head(wq), per_head(wk), per_head(wv)], axis=0)
    # proj: rows of the concat dim belong to head h in blocks of HEAD_DIM
    wproj_heads = wproj.reshape(NUM_HEADS, HEAD_DIM, C)
    vec6 = jnp.stack([ln1g, ln1b, ln2g, ln2b, bproj, b2], axis=0)    # (6, C)
    b1_2d = b1.reshape(1, H)
    # block-diagonal batch mask: 0 within a batch, -1e30 across batches
    tok_b = jnp.arange(BN, dtype=jnp.int32) // N
    attn_bias = jnp.where(tok_b[:, None] == tok_b[None, :], 0.0, NEG_BIG).astype(jnp.float32)
    return wqkv_heads, wproj_heads, w1, w2, vec6, b1_2d, attn_bias


@jax.jit
def block_forward(x, params):
    wqkv_heads, wproj_heads, w1, w2, vec6, b1_2d, attn_bias = _pack_params(params)
    xf = x.reshape(BN, C)                                # flatten (B, N, C) -> (B*N, C)
    vmem = pl.BlockSpec(memory_space=pltpu.MemorySpace.VMEM)
    out = pl.pallas_call(
        block_kernel,
        out_shape=jax.ShapeDtypeStruct((BN, C), jnp.float32),
        in_specs=[vmem] * 8,
        out_specs=vmem,
    )(xf, wqkv_heads, wproj_heads, w1, w2, vec6, b1_2d, attn_bias)
    return out.reshape(B, N, C)


# ----------------------------- pure-JAX reference -----------------------------
def block_reference(x, params):
    (ln1g, ln1b, wqkv, wproj, bproj, ln2g, ln2b, w1, b1, w2, b2) = params

    def ln(v, g, bta):
        mu = jnp.mean(v, -1, keepdims=True)
        var = jnp.mean((v - mu) ** 2, -1, keepdims=True)
        return (v - mu) / jnp.sqrt(var + LN_EPS) * g + bta

    xn = ln(x, ln1g, ln1b)
    qkv = xn @ wqkv                                      # (B, N, 3C)
    q, k, v = jnp.split(qkv, 3, axis=-1)
    q = q.reshape(B, N, NUM_HEADS, HEAD_DIM).transpose(0, 2, 1, 3)
    k = k.reshape(B, N, NUM_HEADS, HEAD_DIM).transpose(0, 2, 1, 3)
    v = v.reshape(B, N, NUM_HEADS, HEAD_DIM).transpose(0, 2, 1, 3)
    attn = jax.nn.softmax((q @ jnp.swapaxes(k, -2, -1)) * SCALE, axis=-1)
    ao = (attn @ v).transpose(0, 2, 1, 3).reshape(B, N, C)
    ao = ao @ wproj + bproj
    x1 = x + ao
    x2n = ln(x1, ln2g, ln2b)
    hdn = jax.nn.gelu(x2n @ w1 + b1, approximate=False)  # exact erf GELU
    return x1 + (hdn @ w2 + b2)


# ----------------------------- param init + main -----------------------------
def init_params(key):
    ks = jax.random.split(key, 12)
    s = 0.02
    ln1g = 1.0 + 0.1 * jax.random.normal(ks[0], (C,), jnp.float32)
    ln1b = 0.1 * jax.random.normal(ks[1], (C,), jnp.float32)
    wqkv = jax.random.normal(ks[2], (C, 3 * C), jnp.float32) * s
    wproj = jax.random.normal(ks[3], (C, C), jnp.float32) * s
    bproj = jax.random.normal(ks[4], (C,), jnp.float32) * s
    ln2g = 1.0 + 0.1 * jax.random.normal(ks[5], (C,), jnp.float32)
    ln2b = 0.1 * jax.random.normal(ks[6], (C,), jnp.float32)
    w1 = jax.random.normal(ks[7], (C, H), jnp.float32) * s
    b1 = jax.random.normal(ks[8], (H,), jnp.float32) * s
    w2 = jax.random.normal(ks[9], (H, C), jnp.float32) * s
    b2 = jax.random.normal(ks[10], (C,), jnp.float32) * s
    return (ln1g, ln1b, wqkv, wproj, bproj, ln2g, ln2b, w1, b1, w2, b2)


if __name__ == "__main__":
    key = jax.random.PRNGKey(0)
    kx, kp = jax.random.split(key)
    x = jax.random.normal(kx, (B, N, C), jnp.float32)
    params = init_params(kp)

    out = jax.block_until_ready(block_forward(x, params))

    ref = block_reference(x, params)
    np.testing.assert_allclose(np.asarray(out), np.asarray(ref),
                               rtol=1e-5, atol=1e-5)
    print("KERNEL_OK")
</pallas_src>

<mosaic_0001>
module attributes {stable_mosaic.version = 11 : i64} {
  func.func @block_kernel(%arg0: memref<16x32xf32, #tpu.memory_space<vmem>>, %arg1: memref<3x4x32x8xf32, #tpu.memory_space<vmem>>, %arg2: memref<4x8x32xf32, #tpu.memory_space<vmem>>, %arg3: memref<32x64xf32, #tpu.memory_space<vmem>>, %arg4: memref<64x32xf32, #tpu.memory_space<vmem>>, %arg5: memref<6x32xf32, #tpu.memory_space<vmem>>, %arg6: memref<1x64xf32, #tpu.memory_space<vmem>>, %arg7: memref<16x16xf32, #tpu.memory_space<vmem>>, %arg8: memref<16x32xf32, #tpu.memory_space<vmem>>) attributes {dimension_semantics = [], scalar_prefetch = 0 : i64, scratch_operands = 0 : i64, tpu.core_type = #tpu.core_type<tc>} {
    %c0 = arith.constant 0 : index
    %c0_0 = arith.constant 0 : index
    %0 = vector.load %arg0[%c0, %c0_0] : memref<16x32xf32, #tpu.memory_space<vmem>>, vector<16x32xf32>
    %c0_1 = arith.constant 0 : index
    %c0_2 = arith.constant 0 : index
    %1 = vector.load %arg5[%c0_1, %c0_2] : memref<6x32xf32, #tpu.memory_space<vmem>>, vector<1x32xf32>
    %c1 = arith.constant 1 : index
    %c0_3 = arith.constant 0 : index
    %2 = vector.load %arg5[%c1, %c0_3] : memref<6x32xf32, #tpu.memory_space<vmem>>, vector<1x32xf32>
    %c2 = arith.constant 2 : index
    %c0_4 = arith.constant 0 : index
    %3 = vector.load %arg5[%c2, %c0_4] : memref<6x32xf32, #tpu.memory_space<vmem>>, vector<1x32xf32>
    %c3 = arith.constant 3 : index
    %c0_5 = arith.constant 0 : index
    %4 = vector.load %arg5[%c3, %c0_5] : memref<6x32xf32, #tpu.memory_space<vmem>>, vector<1x32xf32>
    %c4 = arith.constant 4 : index
    %c0_6 = arith.constant 0 : index
    %5 = vector.load %arg5[%c4, %c0_6] : memref<6x32xf32, #tpu.memory_space<vmem>>, vector<1x32xf32>
    %c5 = arith.constant 5 : index
    %c0_7 = arith.constant 0 : index
    %6 = vector.load %arg5[%c5, %c0_7] : memref<6x32xf32, #tpu.memory_space<vmem>>, vector<1x32xf32>
    %c0_8 = arith.constant 0 : index
    %c0_9 = arith.constant 0 : index
    %7 = vector.load %arg6[%c0_8, %c0_9] : memref<1x64xf32, #tpu.memory_space<vmem>>, vector<1x64xf32>
    %c0_10 = arith.constant 0 : index
    %c0_11 = arith.constant 0 : index
    %8 = vector.load %arg7[%c0_10, %c0_11] : memref<16x16xf32, #tpu.memory_space<vmem>>, vector<16x16xf32>
    %cst = arith.constant dense<0.000000e+00> : vector<16xf32>
    %9 = vector.multi_reduction <add>, %0, %cst [1] : vector<16x32xf32> to vector<16xf32>
    %10 = vector.shape_cast %9 : vector<16xf32> to vector<16x1xf32>
    %cst_12 = arith.constant 3.200000e+01 : f32
    %11 = vector.broadcast %cst_12 : f32 to vector<16x1xf32>
    %12 = arith.divf %10, %11 : vector<16x1xf32>
    %13 = vector.broadcast %12 : vector<16x1xf32> to vector<16x32xf32>
    %14 = arith.subf %0, %13 : vector<16x32xf32>
    %15 = vector.broadcast %12 : vector<16x1xf32> to vector<16x32xf32>
    %16 = arith.subf %0, %15 : vector<16x32xf32>
    %17 = arith.mulf %14, %16 : vector<16x32xf32>
    %cst_13 = arith.constant dense<0.000000e+00> : vector<16xf32>
    %18 = vector.multi_reduction <add>, %17, %cst_13 [1] : vector<16x32xf32> to vector<16xf32>
    %19 = vector.shape_cast %18 : vector<16xf32> to vector<16x1xf32>
    %cst_14 = arith.constant 3.200000e+01 : f32
    %20 = vector.broadcast %cst_14 : f32 to vector<16x1xf32>
    %21 = arith.divf %19, %20 : vector<16x1xf32>
    %22 = vector.broadcast %12 : vector<16x1xf32> to vector<16x32xf32>
    %23 = arith.subf %0, %22 : vector<16x32xf32>
    %cst_15 = arith.constant 9.99999974E-6 : f32
    %24 = vector.broadcast %cst_15 : f32 to vector<16x1xf32>
    %25 = arith.addf %21, %24 : vector<16x1xf32>
    %26 = math.rsqrt %25 : vector<16x1xf32>
    %27 = vector.broadcast %26 : vector<16x1xf32> to vector<16x32xf32>
    %28 = arith.mulf %23, %27 : vector<16x32xf32>
    %29 = vector.broadcast %1 : vector<1x32xf32> to vector<16x32xf32>
    %30 = arith.mulf %28, %29 : vector<16x32xf32>
    %31 = vector.broadcast %2 : vector<1x32xf32> to vector<16x32xf32>
    %32 = arith.addf %30, %31 : vector<16x32xf32>
    %c0_16 = arith.constant 0 : index
    %c0_17 = arith.constant 0 : index
    %c0_18 = arith.constant 0 : index
    %c0_19 = arith.constant 0 : index
    %33 = vector.load %arg1[%c0_16, %c0_17, %c0_18, %c0_19] : memref<3x4x32x8xf32, #tpu.memory_space<vmem>>, vector<1x1x32x8xf32>
    %34 = vector.shape_cast %33 : vector<1x1x32x8xf32> to vector<32x8xf32>
    %cst_20 = arith.constant dense<0.000000e+00> : vector<16x8xf32>
    %35 = tpu.matmul %32, %34, %cst_20 {dimension_numbers = #tpu.dot_dimension_numbers<[1], [0], [0], [1], [0, 0, 1, 1], [], []>} : vector<16x32xf32>, vector<32x8xf32>, vector<16x8xf32> -> vector<16x8xf32>
    %c1_21 = arith.constant 1 : index
    %c0_22 = arith.constant 0 : index
    %c0_23 = arith.constant 0 : index
    %c0_24 = arith.constant 0 : index
    %36 = vector.load %arg1[%c1_21, %c0_22, %c0_23, %c0_24] : memref<3x4x32x8xf32, #tpu.memory_space<vmem>>, vector<1x1x32x8xf32>
    %37 = vector.shape_cast %36 : vector<1x1x32x8xf32> to vector<32x8xf32>
    %cst_25 = arith.constant dense<0.000000e+00> : vector<16x8xf32>
    %38 = tpu.matmul %32, %37, %cst_25 {dimension_numbers = #tpu.dot_dimension_numbers<[1], [0], [0], [1], [0, 0, 1, 1], [], []>} : vector<16x32xf32>, vector<32x8xf32>, vector<16x8xf32> -> vector<16x8xf32>
    %c2_26 = arith.constant 2 : index
    %c0_27 = arith.constant 0 : index
    %c0_28 = arith.constant 0 : index
    %c0_29 = arith.constant 0 : index
    %39 = vector.load %arg1[%c2_26, %c0_27, %c0_28, %c0_29] : memref<3x4x32x8xf32, #tpu.memory_space<vmem>>, vector<1x1x32x8xf32>
    %40 = vector.shape_cast %39 : vector<1x1x32x8xf32> to vector<32x8xf32>
    %cst_30 = arith.constant dense<0.000000e+00> : vector<16x8xf32>
    %41 = tpu.matmul %32, %40, %cst_30 {dimension_numbers = #tpu.dot_dimension_numbers<[1], [0], [0], [1], [0, 0, 1, 1], [], []>} : vector<16x32xf32>, vector<32x8xf32>, vector<16x8xf32> -> vector<16x8xf32>
    %cst_31 = arith.constant dense<0.000000e+00> : vector<16x16xf32>
    %42 = tpu.matmul %35, %38, %cst_31 {dimension_numbers = #tpu.dot_dimension_numbers<[1], [1], [0], [0], [0, 0, 1, 0], [], []>} : vector<16x8xf32>, vector<16x8xf32>, vector<16x16xf32> -> vector<16x16xf32>
    %cst_32 = arith.constant 0.353553385 : f32
    %43 = vector.broadcast %cst_32 : f32 to vector<16x16xf32>
    %44 = arith.mulf %42, %43 : vector<16x16xf32>
    %45 = arith.addf %44, %8 : vector<16x16xf32>
    %cst_33 = arith.constant dense<0xFF800000> : vector<16xf32>
    %46 = vector.multi_reduction <maximumf>, %45, %cst_33 [1] : vector<16x16xf32> to vector<16xf32>
    %47 = vector.shape_cast %46 : vector<16xf32> to vector<16x1xf32>
    %48 = vector.broadcast %47 : vector<16x1xf32> to vector<16x16xf32>
    %49 = arith.subf %45, %48 : vector<16x16xf32>
    %50 = math.exp %49 : vector<16x16xf32>
    %cst_34 = arith.constant dense<0.000000e+00> : vector<16xf32>
    %51 = vector.multi_reduction <add>, %50, %cst_34 [1] : vector<16x16xf32> to vector<16xf32>
    %52 = vector.shape_cast %51 : vector<16xf32> to vector<16x1xf32>
    %53 = vector.broadcast %52 : vector<16x1xf32> to vector<16x16xf32>
    %54 = arith.divf %50, %53 : vector<16x16xf32>
    %cst_35 = arith.constant dense<0.000000e+00> : vector<16x8xf32>
    %55 = tpu.matmul %54, %41, %cst_35 {dimension_numbers = #tpu.dot_dimension_numbers<[1], [0], [0], [1], [0, 0, 1, 1], [], []>} : vector<16x16xf32>, vector<16x8xf32>, vector<16x8xf32> -> vector<16x8xf32>
    %c0_36 = arith.constant 0 : index
    %c0_37 = arith.constant 0 : index
    %c0_38 = arith.constant 0 : index
    %56 = vector.load %arg2[%c0_36, %c0_37, %c0_38] : memref<4x8x32xf32, #tpu.memory_space<vmem>>, vector<1x8x32xf32>
    %57 = vector.shape_cast %56 : vector<1x8x32xf32> to vector<8x32xf32>
    %cst_39 = arith.constant dense<0.000000e+00> : vector<16x32xf32>
    %58 = tpu.matmul %55, %57, %cst_39 {dimension_numbers = #tpu.dot_dimension_numbers<[1], [0], [0], [1], [0, 0, 1, 1], [], []>} : vector<16x8xf32>, vector<8x32xf32>, vector<16x32xf32> -> vector<16x32xf32>
    %c0_40 = arith.constant 0 : index
    %c1_41 = arith.constant 1 : index
    %c0_42 = arith.constant 0 : index
    %c0_43 = arith.constant 0 : index
    %59 = vector.load %arg1[%c0_40, %c1_41, %c0_42, %c0_43] : memref<3x4x32x8xf32, #tpu.memory_space<vmem>>, vector<1x1x32x8xf32>
    %60 = vector.shape_cast %59 : vector<1x1x32x8xf32> to vector<32x8xf32>
    %cst_44 = arith.constant dense<0.000000e+00> : vector<16x8xf32>
    %61 = tpu.matmul %32, %60, %cst_44 {dimension_numbers = #tpu.dot_dimension_numbers<[1], [0], [0], [1], [0, 0, 1, 1], [], []>} : vector<16x32xf32>, vector<32x8xf32>, vector<16x8xf32> -> vector<16x8xf32>
    %c1_45 = arith.constant 1 : index
    %c1_46 = arith.constant 1 : index
    %c0_47 = arith.constant 0 : index
    %c0_48 = arith.constant 0 : index
    %62 = vector.load %arg1[%c1_45, %c1_46, %c0_47, %c0_48] : memref<3x4x32x8xf32, #tpu.memory_space<vmem>>, vector<1x1x32x8xf32>
    %63 = vector.shape_cast %62 : vector<1x1x32x8xf32> to vector<32x8xf32>
    %cst_49 = arith.constant dense<0.000000e+00> : vector<16x8xf32>
    %64 = tpu.matmul %32, %63, %cst_49 {dimension_numbers = #tpu.dot_dimension_numbers<[1], [0], [0], [1], [0, 0, 1, 1], [], []>} : vector<16x32xf32>, vector<32x8xf32>, vector<16x8xf32> -> vector<16x8xf32>
    %c2_50 = arith.constant 2 : index
    %c1_51 = arith.constant 1 : index
    %c0_52 = arith.constant 0 : index
    %c0_53 = arith.constant 0 : index
    %65 = vector.load %arg1[%c2_50, %c1_51, %c0_52, %c0_53] : memref<3x4x32x8xf32, #tpu.memory_space<vmem>>, vector<1x1x32x8xf32>
    %66 = vector.shape_cast %65 : vector<1x1x32x8xf32> to vector<32x8xf32>
    %cst_54 = arith.constant dense<0.000000e+00> : vector<16x8xf32>
    %67 = tpu.matmul %32, %66, %cst_54 {dimension_numbers = #tpu.dot_dimension_numbers<[1], [0], [0], [1], [0, 0, 1, 1], [], []>} : vector<16x32xf32>, vector<32x8xf32>, vector<16x8xf32> -> vector<16x8xf32>
    %cst_55 = arith.constant dense<0.000000e+00> : vector<16x16xf32>
    %68 = tpu.matmul %61, %64, %cst_55 {dimension_numbers = #tpu.dot_dimension_numbers<[1], [1], [0], [0], [0, 0, 1, 0], [], []>} : vector<16x8xf32>, vector<16x8xf32>, vector<16x16xf32> -> vector<16x16xf32>
    %cst_56 = arith.constant 0.353553385 : f32
    %69 = vector.broadcast %cst_56 : f32 to vector<16x16xf32>
    %70 = arith.mulf %68, %69 : vector<16x16xf32>
    %71 = arith.addf %70, %8 : vector<16x16xf32>
    %cst_57 = arith.constant dense<0xFF800000> : vector<16xf32>
    %72 = vector.multi_reduction <maximumf>, %71, %cst_57 [1] : vector<16x16xf32> to vector<16xf32>
    %73 = vector.shape_cast %72 : vector<16xf32> to vector<16x1xf32>
    %74 = vector.broadcast %73 : vector<16x1xf32> to vector<16x16xf32>
    %75 = arith.subf %71, %74 : vector<16x16xf32>
    %76 = math.exp %75 : vector<16x16xf32>
    %cst_58 = arith.constant dense<0.000000e+00> : vector<16xf32>
    %77 = vector.multi_reduction <add>, %76, %cst_58 [1] : vector<16x16xf32> to vector<16xf32>
    %78 = vector.shape_cast %77 : vector<16xf32> to vector<16x1xf32>
    %79 = vector.broadcast %78 : vector<16x1xf32> to vector<16x16xf32>
    %80 = arith.divf %76, %79 : vector<16x16xf32>
    %cst_59 = arith.constant dense<0.000000e+00> : vector<16x8xf32>
    %81 = tpu.matmul %80, %67, %cst_59 {dimension_numbers = #tpu.dot_dimension_numbers<[1], [0], [0], [1], [0, 0, 1, 1], [], []>} : vector<16x16xf32>, vector<16x8xf32>, vector<16x8xf32> -> vector<16x8xf32>
    %c1_60 = arith.constant 1 : index
    %c0_61 = arith.constant 0 : index
    %c0_62 = arith.constant 0 : index
    %82 = vector.load %arg2[%c1_60, %c0_61, %c0_62] : memref<4x8x32xf32, #tpu.memory_space<vmem>>, vector<1x8x32xf32>
    %83 = vector.shape_cast %82 : vector<1x8x32xf32> to vector<8x32xf32>
    %cst_63 = arith.constant dense<0.000000e+00> : vector<16x32xf32>
    %84 = tpu.matmul %81, %83, %cst_63 {dimension_numbers = #tpu.dot_dimension_numbers<[1], [0], [0], [1], [0, 0, 1, 1], [], []>} : vector<16x8xf32>, vector<8x32xf32>, vector<16x32xf32> -> vector<16x32xf32>
    %85 = arith.addf %58, %84 : vector<16x32xf32>
    %c0_64 = arith.constant 0 : index
    %c2_65 = arith.constant 2 : index
    %c0_66 = arith.constant 0 : index
    %c0_67 = arith.constant 0 : index
    %86 = vector.load %arg1[%c0_64, %c2_65, %c0_66, %c0_67] : memref<3x4x32x8xf32, #tpu.memory_space<vmem>>, vector<1x1x32x8xf32>
    %87 = vector.shape_cast %86 : vector<1x1x32x8xf32> to vector<32x8xf32>
    %cst_68 = arith.constant dense<0.000000e+00> : vector<16x8xf32>
    %88 = tpu.matmul %32, %87, %cst_68 {dimension_numbers = #tpu.dot_dimension_numbers<[1], [0], [0], [1], [0, 0, 1, 1], [], []>} : vector<16x32xf32>, vector<32x8xf32>, vector<16x8xf32> -> vector<16x8xf32>
    %c1_69 = arith.constant 1 : index
    %c2_70 = arith.constant 2 : index
    %c0_71 = arith.constant 0 : index
    %c0_72 = arith.constant 0 : index
    %89 = vector.load %arg1[%c1_69, %c2_70, %c0_71, %c0_72] : memref<3x4x32x8xf32, #tpu.memory_space<vmem>>, vector<1x1x32x8xf32>
    %90 = vector.shape_cast %89 : vector<1x1x32x8xf32> to vector<32x8xf32>
    %cst_73 = arith.constant dense<0.000000e+00> : vector<16x8xf32>
    %91 = tpu.matmul %32, %90, %cst_73 {dimension_numbers = #tpu.dot_dimension_numbers<[1], [0], [0], [1], [0, 0, 1, 1], [], []>} : vector<16x32xf32>, vector<32x8xf32>, vector<16x8xf32> -> vector<16x8xf32>
    %c2_74 = arith.constant 2 : index
    %c2_75 = arith.constant 2 : index
    %c0_76 = arith.constant 0 : index
    %c0_77 = arith.constant 0 : index
    %92 = vector.load %arg1[%c2_74, %c2_75, %c0_76, %c0_77] : memref<3x4x32x8xf32, #tpu.memory_space<vmem>>, vector<1x1x32x8xf32>
    %93 = vector.shape_cast %92 : vector<1x1x32x8xf32> to vector<32x8xf32>
    %cst_78 = arith.constant dense<0.000000e+00> : vector<16x8xf32>
    %94 = tpu.matmul %32, %93, %cst_78 {dimension_numbers = #tpu.dot_dimension_numbers<[1], [0], [0], [1], [0, 0, 1, 1], [], []>} : vector<16x32xf32>, vector<32x8xf32>, vector<16x8xf32> -> vector<16x8xf32>
    %cst_79 = arith.constant dense<0.000000e+00> : vector<16x16xf32>
    %95 = tpu.matmul %88, %91, %cst_79 {dimension_numbers = #tpu.dot_dimension_numbers<[1], [1], [0], [0], [0, 0, 1, 0], [], []>} : vector<16x8xf32>, vector<16x8xf32>, vector<16x16xf32> -> vector<16x16xf32>
    %cst_80 = arith.constant 0.353553385 : f32
    %96 = vector.broadcast %cst_80 : f32 to vector<16x16xf32>
    %97 = arith.mulf %95, %96 : vector<16x16xf32>
    %98 = arith.addf %97, %8 : vector<16x16xf32>
    %cst_81 = arith.constant dense<0xFF800000> : vector<16xf32>
    %99 = vector.multi_reduction <maximumf>, %98, %cst_81 [1] : vector<16x16xf32> to vector<16xf32>
    %100 = vector.shape_cast %99 : vector<16xf32> to vector<16x1xf32>
    %101 = vector.broadcast %100 : vector<16x1xf32> to vector<16x16xf32>
    %102 = arith.subf %98, %101 : vector<16x16xf32>
    %103 = math.exp %102 : vector<16x16xf32>
    %cst_82 = arith.constant dense<0.000000e+00> : vector<16xf32>
    %104 = vector.multi_reduction <add>, %103, %cst_82 [1] : vector<16x16xf32> to vector<16xf32>
    %105 = vector.shape_cast %104 : vector<16xf32> to vector<16x1xf32>
    %106 = vector.broadcast %105 : vector<16x1xf32> to vector<16x16xf32>
    %107 = arith.divf %103, %106 : vector<16x16xf32>
    %cst_83 = arith.constant dense<0.000000e+00> : vector<16x8xf32>
    %108 = tpu.matmul %107, %94, %cst_83 {dimension_numbers = #tpu.dot_dimension_numbers<[1], [0], [0], [1], [0, 0, 1, 1], [], []>} : vector<16x16xf32>, vector<16x8xf32>, vector<16x8xf32> -> vector<16x8xf32>
    %c2_84 = arith.constant 2 : index
    %c0_85 = arith.constant 0 : index
    %c0_86 = arith.constant 0 : index
    %109 = vector.load %arg2[%c2_84, %c0_85, %c0_86] : memref<4x8x32xf32, #tpu.memory_space<vmem>>, vector<1x8x32xf32>
    %110 = vector.shape_cast %109 : vector<1x8x32xf32> to vector<8x32xf32>
    %cst_87 = arith.constant dense<0.000000e+00> : vector<16x32xf32>
    %111 = tpu.matmul %108, %110, %cst_87 {dimension_numbers = #tpu.dot_dimension_numbers<[1], [0], [0], [1], [0, 0, 1, 1], [], []>} : vector<16x8xf32>, vector<8x32xf32>, vector<16x32xf32> -> vector<16x32xf32>
    %112 = arith.addf %85, %111 : vector<16x32xf32>
    %c0_88 = arith.constant 0 : index
    %c3_89 = arith.constant 3 : index
    %c0_90 = arith.constant 0 : index
    %c0_91 = arith.constant 0 : index
    %113 = vector.load %arg1[%c0_88, %c3_89, %c0_90, %c0_91] : memref<3x4x32x8xf32, #tpu.memory_space<vmem>>, vector<1x1x32x8xf32>
    %114 = vector.shape_cast %113 : vector<1x1x32x8xf32> to vector<32x8xf32>
    %cst_92 = arith.constant dense<0.000000e+00> : vector<16x8xf32>
    %115 = tpu.matmul %32, %114, %cst_92 {dimension_numbers = #tpu.dot_dimension_numbers<[1], [0], [0], [1], [0, 0, 1, 1], [], []>} : vector<16x32xf32>, vector<32x8xf32>, vector<16x8xf32> -> vector<16x8xf32>
    %c1_93 = arith.constant 1 : index
    %c3_94 = arith.constant 3 : index
    %c0_95 = arith.constant 0 : index
    %c0_96 = arith.constant 0 : index
    %116 = vector.load %arg1[%c1_93, %c3_94, %c0_95, %c0_96] : memref<3x4x32x8xf32, #tpu.memory_space<vmem>>, vector<1x1x32x8xf32>
    %117 = vector.shape_cast %116 : vector<1x1x32x8xf32> to vector<32x8xf32>
    %cst_97 = arith.constant dense<0.000000e+00> : vector<16x8xf32>
    %118 = tpu.matmul %32, %117, %cst_97 {dimension_numbers = #tpu.dot_dimension_numbers<[1], [0], [0], [1], [0, 0, 1, 1], [], []>} : vector<16x32xf32>, vector<32x8xf32>, vector<16x8xf32> -> vector<16x8xf32>
    %c2_98 = arith.constant 2 : index
    %c3_99 = arith.constant 3 : index
    %c0_100 = arith.constant 0 : index
    %c0_101 = arith.constant 0 : index
    %119 = vector.load %arg1[%c2_98, %c3_99, %c0_100, %c0_101] : memref<3x4x32x8xf32, #tpu.memory_space<vmem>>, vector<1x1x32x8xf32>
    %120 = vector.shape_cast %119 : vector<1x1x32x8xf32> to vector<32x8xf32>
    %cst_102 = arith.constant dense<0.000000e+00> : vector<16x8xf32>
    %121 = tpu.matmul %32, %120, %cst_102 {dimension_numbers = #tpu.dot_dimension_numbers<[1], [0], [0], [1], [0, 0, 1, 1], [], []>} : vector<16x32xf32>, vector<32x8xf32>, vector<16x8xf32> -> vector<16x8xf32>
    %cst_103 = arith.constant dense<0.000000e+00> : vector<16x16xf32>
    %122 = tpu.matmul %115, %118, %cst_103 {dimension_numbers = #tpu.dot_dimension_numbers<[1], [1], [0], [0], [0, 0, 1, 0], [], []>} : vector<16x8xf32>, vector<16x8xf32>, vector<16x16xf32> -> vector<16x16xf32>
    %cst_104 = arith.constant 0.353553385 : f32
    %123 = vector.broadcast %cst_104 : f32 to vector<16x16xf32>
    %124 = arith.mulf %122, %123 : vector<16x16xf32>
    %125 = arith.addf %124, %8 : vector<16x16xf32>
    %cst_105 = arith.constant dense<0xFF800000> : vector<16xf32>
    %126 = vector.multi_reduction <maximumf>, %125, %cst_105 [1] : vector<16x16xf32> to vector<16xf32>
    %127 = vector.shape_cast %126 : vector<16xf32> to vector<16x1xf32>
    %128 = vector.broadcast %127 : vector<16x1xf32> to vector<16x16xf32>
    %129 = arith.subf %125, %128 : vector<16x16xf32>
    %130 = math.exp %129 : vector<16x16xf32>
    %cst_106 = arith.constant dense<0.000000e+00> : vector<16xf32>
    %131 = vector.multi_reduction <add>, %130, %cst_106 [1] : vector<16x16xf32> to vector<16xf32>
    %132 = vector.shape_cast %131 : vector<16xf32> to vector<16x1xf32>
    %133 = vector.broadcast %132 : vector<16x1xf32> to vector<16x16xf32>
    %134 = arith.divf %130, %133 : vector<16x16xf32>
    %cst_107 = arith.constant dense<0.000000e+00> : vector<16x8xf32>
    %135 = tpu.matmul %134, %121, %cst_107 {dimension_numbers = #tpu.dot_dimension_numbers<[1], [0], [0], [1], [0, 0, 1, 1], [], []>} : vector<16x16xf32>, vector<16x8xf32>, vector<16x8xf32> -> vector<16x8xf32>
    %c3_108 = arith.constant 3 : index
    %c0_109 = arith.constant 0 : index
    %c0_110 = arith.constant 0 : index
    %136 = vector.load %arg2[%c3_108, %c0_109, %c0_110] : memref<4x8x32xf32, #tpu.memory_space<vmem>>, vector<1x8x32xf32>
    %137 = vector.shape_cast %136 : vector<1x8x32xf32> to vector<8x32xf32>
    %cst_111 = arith.constant dense<0.000000e+00> : vector<16x32xf32>
    %138 = tpu.matmul %135, %137, %cst_111 {dimension_numbers = #tpu.dot_dimension_numbers<[1], [0], [0], [1], [0, 0, 1, 1], [], []>} : vector<16x8xf32>, vector<8x32xf32>, vector<16x32xf32> -> vector<16x32xf32>
    %139 = arith.addf %112, %138 : vector<16x32xf32>
    %140 = arith.addf %0, %139 : vector<16x32xf32>
    %141 = vector.broadcast %5 : vector<1x32xf32> to vector<16x32xf32>
    %142 = arith.addf %140, %141 : vector<16x32xf32>
    %cst_112 = arith.constant dense<0.000000e+00> : vector<16xf32>
    %143 = vector.multi_reduction <add>, %142, %cst_112 [1] : vector<16x32xf32> to vector<16xf32>
    %144 = vector.shape_cast %143 : vector<16xf32> to vector<16x1xf32>
    %cst_113 = arith.constant 3.200000e+01 : f32
    %145 = vector.broadcast %cst_113 : f32 to vector<16x1xf32>
    %146 = arith.divf %144, %145 : vector<16x1xf32>
    %147 = vector.broadcast %146 : vector<16x1xf32> to vector<16x32xf32>
    %148 = arith.subf %142, %147 : vector<16x32xf32>
    %149 = vector.broadcast %146 : vector<16x1xf32> to vector<16x32xf32>
    %150 = arith.subf %142, %149 : vector<16x32xf32>
    %151 = arith.mulf %148, %150 : vector<16x32xf32>
    %cst_114 = arith.constant dense<0.000000e+00> : vector<16xf32>
    %152 = vector.multi_reduction <add>, %151, %cst_114 [1] : vector<16x32xf32> to vector<16xf32>
    %153 = vector.shape_cast %152 : vector<16xf32> to vector<16x1xf32>
    %cst_115 = arith.constant 3.200000e+01 : f32
    %154 = vector.broadcast %cst_115 : f32 to vector<16x1xf32>
    %155 = arith.divf %153, %154 : vector<16x1xf32>
    %156 = vector.broadcast %146 : vector<16x1xf32> to vector<16x32xf32>
    %157 = arith.subf %142, %156 : vector<16x32xf32>
    %cst_116 = arith.constant 9.99999974E-6 : f32
    %158 = vector.broadcast %cst_116 : f32 to vector<16x1xf32>
    %159 = arith.addf %155, %158 : vector<16x1xf32>
    %160 = math.rsqrt %159 : vector<16x1xf32>
    %161 = vector.broadcast %160 : vector<16x1xf32> to vector<16x32xf32>
    %162 = arith.mulf %157, %161 : vector<16x32xf32>
    %163 = vector.broadcast %3 : vector<1x32xf32> to vector<16x32xf32>
    %164 = arith.mulf %162, %163 : vector<16x32xf32>
    %165 = vector.broadcast %4 : vector<1x32xf32> to vector<16x32xf32>
    %166 = arith.addf %164, %165 : vector<16x32xf32>
    %c0_117 = arith.constant 0 : index
    %c0_118 = arith.constant 0 : index
    %167 = vector.load %arg3[%c0_117, %c0_118] : memref<32x64xf32, #tpu.memory_space<vmem>>, vector<32x64xf32>
    %cst_119 = arith.constant dense<0.000000e+00> : vector<16x64xf32>
    %168 = tpu.matmul %166, %167, %cst_119 {dimension_numbers = #tpu.dot_dimension_numbers<[1], [0], [0], [1], [0, 0, 1, 1], [], []>} : vector<16x32xf32>, vector<32x64xf32>, vector<16x64xf32> -> vector<16x64xf32>
    %169 = vector.broadcast %7 : vector<1x64xf32> to vector<16x64xf32>
    %170 = arith.addf %168, %169 : vector<16x64xf32>
    %cst_120 = arith.constant 5.000000e-01 : f32
    %171 = vector.broadcast %cst_120 : f32 to vector<16x64xf32>
    %172 = arith.mulf %171, %170 : vector<16x64xf32>
    %cst_121 = arith.constant 0.707106769 : f32
    %173 = vector.broadcast %cst_121 : f32 to vector<16x64xf32>
    %174 = arith.mulf %170, %173 : vector<16x64xf32>
    %cst_122 = arith.constant 0.000000e+00 : f32
    %175 = vector.broadcast %cst_122 : f32 to vector<16x64xf32>
    %176 = arith.cmpf oge, %174, %175 : vector<16x64xf32>
    %cst_123 = arith.constant 1.000000e+00 : f32
    %cst_124 = arith.constant -1.000000e+00 : f32
    %177 = vector.broadcast %cst_123 : f32 to vector<16x64xf32>
    %178 = vector.broadcast %cst_124 : f32 to vector<16x64xf32>
    %179 = arith.select %176, %177, %178 : vector<16x64xi1>, vector<16x64xf32>
    %180 = math.absf %174 : vector<16x64xf32>
    %cst_125 = arith.constant 0.327591091 : f32
    %181 = vector.broadcast %cst_125 : f32 to vector<16x64xf32>
    %182 = arith.mulf %181, %180 : vector<16x64xf32>
    %cst_126 = arith.constant 1.000000e+00 : f32
    %183 = vector.broadcast %cst_126 : f32 to vector<16x64xf32>
    %184 = arith.addf %183, %182 : vector<16x64xf32>
    %cst_127 = arith.constant 1.000000e+00 : f32
    %185 = vector.broadcast %cst_127 : f32 to vector<16x64xf32>
    %186 = arith.divf %185, %184 : vector<16x64xf32>
    %cst_128 = arith.constant 1.06140542 : f32
    %187 = vector.broadcast %cst_128 : f32 to vector<16x64xf32>
    %188 = arith.mulf %187, %186 : vector<16x64xf32>
    %cst_129 = arith.constant -1.45315206 : f32
    %189 = vector.broadcast %cst_129 : f32 to vector<16x64xf32>
    %190 = arith.addf %188, %189 : vector<16x64xf32>
    %191 = arith.mulf %190, %186 : vector<16x64xf32>
    %cst_130 = arith.constant 1.42141378 : f32
    %192 = vector.broadcast %cst_130 : f32 to vector<16x64xf32>
    %193 = arith.addf %191, %192 : vector<16x64xf32>
    %194 = arith.mulf %193, %186 : vector<16x64xf32>
    %cst_131 = arith.constant -0.284496725 : f32
    %195 = vector.broadcast %cst_131 : f32 to vector<16x64xf32>
    %196 = arith.addf %194, %195 : vector<16x64xf32>
    %197 = arith.mulf %196, %186 : vector<16x64xf32>
    %cst_132 = arith.constant 0.254829586 : f32
    %198 = vector.broadcast %cst_132 : f32 to vector<16x64xf32>
    %199 = arith.addf %197, %198 : vector<16x64xf32>
    %200 = arith.mulf %199, %186 : vector<16x64xf32>
    %cst_133 = arith.constant 0.000000e+00 : f32
    %201 = vector.broadcast %cst_133 : f32 to vector<16x64xf32>
    %202 = arith.subf %201, %180 : vector<16x64xf32>
    %203 = arith.mulf %202, %180 : vector<16x64xf32>
    %204 = math.exp %203 : vector<16x64xf32>
    %205 = arith.mulf %200, %204 : vector<16x64xf32>
    %cst_134 = arith.constant 1.000000e+00 : f32
    %206 = vector.broadcast %cst_134 : f32 to vector<16x64xf32>
    %207 = arith.subf %206, %205 : vector<16x64xf32>
    %208 = arith.mulf %179, %207 : vector<16x64xf32>
    %cst_135 = arith.constant 1.000000e+00 : f32
    %209 = vector.broadcast %cst_135 : f32 to vector<16x64xf32>
    %210 = arith.addf %209, %208 : vector<16x64xf32>
    %211 = arith.mulf %172, %210 : vector<16x64xf32>
    %c0_136 = arith.constant 0 : index
    %c0_137 = arith.constant 0 : index
    %212 = vector.load %arg4[%c0_136, %c0_137] : memref<64x32xf32, #tpu.memory_space<vmem>>, vector<64x32xf32>
    %cst_138 = arith.constant dense<0.000000e+00> : vector<16x32xf32>
    %213 = tpu.matmul %211, %212, %cst_138 {dimension_numbers = #tpu.dot_dimension_numbers<[1], [0], [0], [1], [0, 0, 1, 1], [], []>} : vector<16x64xf32>, vector<64x32xf32>, vector<16x32xf32> -> vector<16x32xf32>
    %214 = vector.broadcast %6 : vector<1x32xf32> to vector<16x32xf32>
    %215 = arith.addf %213, %214 : vector<16x32xf32>
    %216 = arith.addf %142, %215 : vector<16x32xf32>
    %c0_139 = arith.constant 0 : index
    %c0_140 = arith.constant 0 : index
    %217 = vector.load %arg8[%c0_139, %c0_140] : memref<16x32xf32, #tpu.memory_space<vmem>>, vector<16x32xf32>
    tpu.vector_store %arg8[%c0_139, %c0_140], %216 {strides = array<i32>} : memref<16x32xf32, #tpu.memory_space<vmem>>, vector<16x32xf32>,
    return
  }
}

</mosaic_0001>

<bundles_post_ra>
// kernel: block_forward.1
= control target key start
LH: loop header
LB: loop body
LE: loop exit
PB: predicated region body
PF: predicated region fallthrough
CT: control target
= control target key end

     0   :  { %vm41_vm0 = vcmask 261120   ;;  %s3640_s0 = inlined_call_operand.vmem [shape: f32[16,32], index: 0, kind: input, shape index: {}]   ;;  %s3641_s1 = inlined_call_operand.vmem [shape: f32[3,4,32,8], index: 1, kind: input, shape index: {}]   ;;  %s3642_s2 = inlined_call_operand.vmem [shape: f32[4,8,32], index: 2, kind: input, shape index: {}]   ;;  %s3643_s3 = inlined_call_operand.vmem [shape: f32[32,64], index: 3, kind: input, shape index: {}]   ;;  %s3644_s4 = inlined_call_operand.vmem [shape: f32[64,32], index: 4, kind: input, shape index: {}]   ;;  %s3645_s5 = inlined_call_operand.vmem [shape: f32[6,32], index: 5, kind: input, shape index: {}]   ;;  %s3646_s6 = inlined_call_operand.vmem [shape: f32[1,64], index: 6, kind: input, shape index: {}]   ;;  %s3647_s7 = inlined_call_operand.vmem [shape: f32[16,16], index: 7, kind: input, shape index: {}]   ;;  %s3648_s8 = inlined_call_operand.hbm [shape: f32[16,32], index: 8, kind: output, shape index: {}]  }
   0x1   :  { %v3242_v0 = vld [vmem:[%s3640_s0] sm:$0xff]  ;;  %v3247_v1 = vld [vmem:[%s3640_s0 + $0x8] sm:$0xff] }
   0x2   :  { %13 = vsyncpa [#allocation3], 0  ;;  %v42_v2 = vsel %vm41_vm0, %v3242_v0, 0.0  ;;  %v45_v3 = vsel %vm41_vm0, %v3247_v1, 0.0  ;;  %v81_v14 = vld [vmem:[%s3641_s1] sm:$0xff]  ;;  %v82_v15 = vld [vmem:[%s3641_s1 + $0x8] sm:$0xff] }
   0x3   :  { %43 = vadd.xlane.f32.xlu0 %v42_v2  ;;  %v2948_v16 = vpack.c.bf16 %v82_v15, %v81_v14  ;;  %v2474_v17 = vld [vmem:[%s3641_s1 + $0x100] sm:$0xff]  ;;  %v2475_v18 = vld [vmem:[%s3641_s1 + $0x108] sm:$0xff]  ;;  %v83_v20 = vld [vmem:[%s3641_s1 + $0x10] sm:$0xff]  ;;  %vm326_vm1 = vcmask 64512   ;;  %vm418_vm3 = vcmask 130048   ;;  %vm2362_vm6 = vcmask 523264  }
   0x4   :  { %v2964_v19 = vpack.c.bf16 %v2475_v18, %v2474_v17  ;;  %v84_v21 = vld [vmem:[%s3641_s1 + $0x18] sm:$0xff]  ;;  %v2476_v23 = vld [vmem:[%s3641_s1 + $0x110] sm:$0xff]  ;;  %v2468_v26 = vld [vmem:[%s3641_s1 + $0x80] sm:$0xff]  ;;  %s3191_s28 = smov [#allocation2]  }
   0x5   :  { %2949 = vmatprep.subr.bf16.mxu1 %v2948_v16  ;;  %v2952_v22 = vpack.c.bf16 %v84_v21, %v83_v20  ;;  %v2477_v24 = vld [vmem:[%s3641_s1 + $0x118] sm:$0xff]  ;;  %v2469_v27 = vld [vmem:[%s3641_s1 + $0x88] sm:$0xff]  ;;  %v2464_v36 = vld [vmem:[%s3645_s5] ss:$0 sm:$0xff]  ;;  %s2453_s29 = sshll.u32 %s3191_s28, 4  ;;  %s2454_s29 = int_to_ptr.vmem [resolvable:$true] %s2453_s29 }
   0x6   :  { %2951 = vmatpush3.bf16.msra.mxu1 %v2948_v16  ;;  %2965 = vmatprep.subr.bf16.mxu0 %v2964_v19  ;;  %v2968_v25 = vpack.c.bf16 %v2477_v24, %v2476_v23  ;;  %v2956_v28 = vpack.c.bf16 %v2469_v27, %v2468_v26  ;;  %v2465_v38 = vld [vmem:[%s3645_s5 + $0x1] ss:$0 sm:$0xff]  ;;  %v2470_v43 = vld [vmem:[%s3641_s1 + $0x90] sm:$0xff]  ;;  %v2471_v44 = vld [vmem:[%s3641_s1 + $0x98] sm:$0xff]  ;;  %s3166_s30 = scalar_lea.vmem %s2454_s29, 256  ;;  %p3171_p1 = scmp.lt.s32.totalorder %s2454_s29, %s2454_s29 }
   0x7   :  { %46 = vadd.xlane.f32.xlu0 %v45_v3  ;;  %2967 = vmatpush3.bf16.msra.mxu0 %v2964_v19  ;;  %v2960_v47 = vpack.c.bf16 %v2471_v44, %v2470_v43  ;;  %v2486_v53 = vld [vmem:[%s3641_s1 + $0x20] sm:$0xff]  ;;  %v2487_v54 = vld [vmem:[%s3641_s1 + $0x28] sm:$0xff]  ;;  %vm3324_vm2 = vmpackc.low %vm326_vm1, %vm326_vm1  ;;  %p3167_p0 = scmp.ne.s32.totalorder %s2454_s29, %s3166_s30  ;;  %p3172_p2 = scmp.lt.s32.totalorder %s3166_s30, %s3166_s30 }
   0x8   :  { %2953 = vmatprep.subr.bf16.mxu1 %v2952_v22  ;;  %2969 = vmatprep.subr.bf16.mxu0 %v2968_v25  ;;  %v2982_v59 = vpack.c.bf16 %v2487_v54, %v2486_v53  ;;  %v2488_v60 = vld [vmem:[%s3641_s1 + $0x30] sm:$0xff]  ;;  %v2489_v61 = vld [vmem:[%s3641_s1 + $0x38] sm:$0xff]  ;;  %v2498_v63 = vld [vmem:[%s3641_s1 + $0x120] sm:$0xff] }
   0x9   :  { %v2986_v62 = vpack.c.bf16 %v2489_v61, %v2488_v60  ;;  %v2499_v2 = vld [vmem:[%s3641_s1 + $0x128] sm:$0xff]  ;;  %p3173_p3 = por %p3172_p2, %p3171_p1 }
   0xa   :  { %2955 = vmatpush3.bf16.msra.mxu1 %v2952_v22  ;;  %v2998_v3 = vpack.c.bf16 %v2499_v2, %v2498_v63 }
   0xb   :  { %2971 = vmatpush3.bf16.msra.mxu0 %v2968_v25  ;;  %2957 = vmatprep.subr.bf16.mxu1 %v2956_v28  ;;  %p3174_p4 = pnand %p3173_p3, %p3167_p0 }
  0x90   :  { %v44_v4 = vpop.xlane.xlu0 %43 }
  0x91   :  { %v49_v5 = vmul.f32 0.03125, %v44_v4  ;;  %v2500_v4 = vld [vmem:[%s3641_s1 + $0x130] sm:$0xff] }
  0x93   :  { %v51_v6 = vsub.f32 %v3242_v0, %v49_v5  ;;  %v2501_v5 = vld [vmem:[%s3641_s1 + $0x138] sm:$0xff] }
  0x94   :  { %v47_v7 = vpop.xlane.xlu0 %46 }
  0x95   :  { %v50_v8 = vmul.f32 0.03125, %v47_v7  ;;  %v53_v9 = vmul.f32 %v51_v6, %v51_v6 }
  0x97   :  { %v52_v10 = vsub.f32 %v3247_v1, %v50_v8  ;;  %v55_v11 = vsel %vm41_vm0, %v53_v9, 0.0  ;;  %v3362_v8 = vld [vmem:[%s3647_s7 + $0x8] sm:$0xff] }
  0x98   :  { %56 = vadd.xlane.f32.xlu1 %v55_v11  ;;  %v3367_v11 = vld [vmem:[%s3647_s7] sm:$0xff] }
  0x99   :  { %v54_v12 = vmul.f32 %v52_v10, %v52_v10 }
  0x9b   :  { %v58_v13 = vsel %vm41_vm0, %v54_v12, 0.0 }
  0x9c   :  { %59 = vadd.xlane.f32.xlu1 %v58_v13 }
 0x125   :  { %v57_v29 = vpop.xlane.xlu1 %56 }
 0x126   :  { %v61_v30 = vmul.f32 0.03125, %v57_v29 }
 0x128   :  { %v63_v31 = vadd.f32 1e-05, %v61_v30 }
 0x129   :  { %v60_v32 = vpop.xlane.xlu1 %59 }
 0x12a   :  { %3118 = vrsqrt.f32 %v63_v31  ;;  %v62_v33 = vmul.f32 0.03125, %v60_v32  ;;  %v2492_v32 = vld [vmem:[%s3641_s1 + $0xa0] sm:$0xff] }
 0x12c   :  { %v64_v34 = vadd.f32 1e-05, %v62_v33  ;;  %v2493_v33 = vld [vmem:[%s3641_s1 + $0xa8] sm:$0xff] }
 0x12e   :  { %3120 = vrsqrt.f32 %v64_v34  ;;  %v2990_v34 = vpack.c.bf16 %v2493_v33, %v2492_v32 }
 0x134   :  { %v3119_v35 = vpop.eup %3118 }
 0x135   :  { %v67_v37 = vmul.f32 %v3119_v35, %v51_v6  ;;  %v3002_v6 = vpack.c.bf16 %v2501_v5, %v2500_v4 }
 0x137   :  { %v73_v39 = vmul.f32 %v2464_v36, %v67_v37 }
 0x138   :  { %v3121_v40 = vpop.eup %3120 }
 0x139   :  { %v3293_v41 = vadd.f32 %v2465_v38, %v73_v39  ;;  %v68_v42 = vmul.f32 %v3121_v40, %v52_v10  ;;  %v2495_v39 = vld [vmem:[%s3641_s1 + $0xb8] sm:$0xff] }
 0x13b   :  { %v74_v45 = vmul.f32 %v2464_v36, %v68_v42  ;;  %2718 = vmatprep.mubr.msk.f32.mxu1 %vm41_vm0, %v3293_v41  ;;  %2740 = vmatprep.mubr.msk.f32.mxu0 %vm41_vm0, %v3293_v41 }
 0x13d   :  { %v3305_v46 = vadd.f32 %v2465_v38, %v74_v45  ;;  %v2494_v38 = vld [vmem:[%s3641_s1 + $0xb0] sm:$0xff] }
 0x13e   :  { %v2994_v44 = vpack.c.bf16 %v2495_v39, %v2494_v38 }
 0x13f   :  { %2719 = vmatmul.mubr.msk.f32.vlgmr.msra.gmra.mrb[0].mxu1 %vm41_vm0, %v3305_v46  ;;  %2741 = vmatmul.mubr.msk.f32.vlgmr.msra.gmra.mrb[0].mxu0 %vm41_vm0, %v3305_v46 }
 0x140   :  { %2959 = vmatpush3.bf16.msra.mxu1 %v2956_v28  ;;  %2729 = vmatprep.mubr.msk.f32.mxu1 %vm41_vm0, %v3293_v41 }
 0x141   :  { %2961 = vmatprep.subr.bf16.mxu1 %v2960_v47 }
 0x144   :  { %2963 = vmatpush3.bf16.msra.mxu1 %v2960_v47 }
 0x147   :  { %2730 = vmatmul.mubr.msk.f32.vlgmr.msra.gmra.mrb[2].mxu1 %vm41_vm0, %v3305_v46 }
 0x212   :  { %v2720_v48 = vpop.f32.mrb[0].mxu1  ;;  %v2742_v49 = vpop.f32.mrb[0].mxu0 }
 0x213   :  { %v157_v50 = vpop.f32.mrb[1].mxu1  ;;  %v317_v51 = vpop.f32.mrb[1].mxu0 }
 0x214   :  { %v2978_v52 = vpack.c.bf16 %v2742_v49, %v317_v51  ;;  %2747 = vmatprep.mubr.msk.f32.mxu1 %vm326_vm1, %v157_v50 }
 0x216   :  { %2979 = vmatprep.subr.bf16.mxu0 %v2978_v52 }
 0x217   :  { %2981 = vmatpush3.bf16.msra.mxu0 %v2978_v52 }
 0x218   :  { %2991 = vmatprep.subr.bf16.mxu0 %v2990_v34 }
 0x21a   :  { %v2731_v55 = vpop.f32.mrb[2].mxu1 }
 0x21b   :  { %v237_v56 = vpop.f32.mrb[3].mxu1 }
 0x21c   :  { %v2972_v58 = vpack.c.bf16 %v2731_v55, %v237_v56 }
 0x21e   :  { %2974 = vmatprep.subr.msk.bf16.mxu1 %vm3324_vm2, %v2972_v58 }
 0x21f   :  { %2977 = vmatpush3.bf16.xpose.msk.msra.mxu1 %vm3324_vm2, %v2972_v58 }
 0x220   :  { %2983 = vmatprep.subr.bf16.mxu1 %v2982_v59 }
 0x226   :  { %2748 = vmatmul.mubr.msk.f32.vlgmr.msra.gmra.mrb[4].mxu1 %vm326_vm1, %v2720_v48 }
 0x227   :  { %2985 = vmatpush3.bf16.msra.mxu1 %v2982_v59  ;;  %2765 = vmatprep.mubr.msk.f32.mxu1 %vm41_vm0, %v3293_v41 }
 0x228   :  { %2987 = vmatprep.subr.bf16.mxu1 %v2986_v62 }
 0x22b   :  { %2989 = vmatpush3.bf16.msra.mxu1 %v2986_v62 }
 0x22c   :  { %2999 = vmatprep.subr.bf16.mxu1 %v2998_v3 }
 0x22e   :  { %2766 = vmatmul.mubr.msk.f32.vlgmr.msra.gmra.mrb[6].mxu1 %vm41_vm0, %v3305_v46 }
 0x22f   :  { %3001 = vmatpush3.bf16.msra.mxu1 %v2998_v3  ;;  %2787 = vmatprep.mubr.msk.f32.mxu1 %vm41_vm0, %v3293_v41 }
 0x230   :  { %3003 = vmatprep.subr.bf16.mxu1 %v3002_v6 }
 0x233   :  { %3005 = vmatpush3.bf16.msra.mxu1 %v3002_v6 }
 0x236   :  { %2788 = vmatmul.mubr.msk.f32.vlgmr.msra.gmra.mrb[8].mxu1 %vm41_vm0, %v3305_v46 }
 0x2f9   :  { %v2749_v7 = vpop.f32.mrb[4].mxu1 }
 0x2fa   :  { %v415_v9 = vmul.f32 0.35355338, %v2749_v7  ;;  %v405_v10 = vpop.f32.mrb[5].mxu1 }
 0x2fb   :  { %v414_v12 = vmul.f32 0.35355338, %v405_v10  ;;  %v2516_v10 = vld [vmem:[%s3641_s1 + $0x48] sm:$0xff] }
 0x2fc   :  { %v417_v13 = vadd.f32 %v415_v9, %v3362_v8  ;;  %v2515_v9 = vld [vmem:[%s3641_s1 + $0x40] sm:$0xff] }
 0x2fd   :  { %v416_v14 = vadd.f32 %v414_v12, %v3367_v11  ;;  %v3016_v12 = vpack.c.bf16 %v2516_v10, %v2515_v9  ;;  %v2539_v9 = vld [vmem:[%s3642_s2 + $0x10] sm:$0xff] }
 0x2fe   :  { %v422_v15 = vsel %vm418_vm3, %v417_v13, -inf }
 0x2ff   :  { %423 = vmax.xlane.f32.xlu1 %v422_v15  ;;  %v419_v16 = vsel %vm418_vm3, %v416_v14, -inf }
 0x300   :  { %420 = vmax.xlane.f32.xlu0 %v419_v16 }
 0x301   :  { %v2767_v17 = vpop.f32.mrb[6].mxu1 }
 0x302   :  { %v594_v18 = vpop.f32.mrb[7].mxu1 }
 0x309   :  { %v2789_v19 = vpop.f32.mrb[8].mxu1 }
 0x30a   :  { %v754_v20 = vpop.f32.mrb[9].mxu1 }
 0x30b   :  { %v3012_v21 = vpack.c.bf16 %v2789_v19, %v754_v20 }
 0x30d   :  { %3013 = vmatprep.subr.bf16.mxu1 %v3012_v21 }
 0x30e   :  { %3015 = vmatpush3.bf16.msra.mxu1 %v3012_v21 }
 0x30f   :  { %3017 = vmatprep.subr.bf16.mxu1 %v3016_v12 }
 0x38c   :  { %v424_v22 = vpop.xlane.xlu1 %423 }
 0x38d   :  { %v426_v23 = vsub.f32 %v417_v13, %v424_v22  ;;  %v421_v24 = vpop.xlane.xlu0 %420  ;;  %v2510_v13 = vld [vmem:[%s3642_s2 + $0x8] sm:$0xff] }
 0x38e   :  { %v425_v25 = vsub.f32 %v416_v14, %v421_v24  ;;  %v2528_v24 = vld [vmem:[%s3641_s1 + $0x148] sm:$0xff] }
 0x38f   :  { %v429_v26 = vmul.f32 1.442695, %v426_v23  ;;  %v2527_v23 = vld [vmem:[%s3641_s1 + $0x140] sm:$0xff] }
 0x390   :  { %v427_v27 = vmul.f32 1.442695, %v425_v25  ;;  %v3032_v25 = vpack.c.bf16 %v2528_v24, %v2527_v23  ;;  %v2556_v23 = vld [vmem:[%s3641_s1 + $0x170] sm:$0xff]  ;;  %v2557_v24 = vld [vmem:[%s3641_s1 + $0x178] sm:$0xff] }
 0x391   :  { %3122 = vpow2.f32 %v429_v26  ;;  %v2529_v26 = vld [vmem:[%s3641_s1 + $0x150] sm:$0xff] }
 0x392   :  { %3124 = vpow2.f32 %v427_v27  ;;  %v2530_v27 = vld [vmem:[%s3641_s1 + $0x158] sm:$0xff] }
 0x39b   :  { %v3123_v28 = vpop.eup %3122 }
 0x39c   :  { %v3125_v29 = vpop.eup %3124  ;;  %v434_v30 = vsel %vm418_vm3, %v3123_v28, 0.0 }
 0x39d   :  { %435 = vadd.xlane.f32.xlu1 %v434_v30  ;;  %v431_v31 = vsel %vm418_vm3, %v3125_v29, 0.0  ;;  %v2521_v30 = vld [vmem:[%s3641_s1 + $0xc0] sm:$0xff] }
 0x39e   :  { %432 = vadd.xlane.f32.xlu0 %v431_v31  ;;  %v2522_v31 = vld [vmem:[%s3641_s1 + $0xc8] sm:$0xff] }
 0x42a   :  { %v436_v35 = vpop.xlane.xlu1 %435 }
 0x42b   :  { %3126 = vrcp.f32 %v436_v35  ;;  %v433_v36 = vpop.xlane.xlu0 %432  ;;  %v2523_v35 = vld [vmem:[%s3641_s1 + $0xd0] sm:$0xff] }
 0x42c   :  { %3128 = vrcp.f32 %v433_v36  ;;  %v2524_v36 = vld [vmem:[%s3641_s1 + $0xd8] sm:$0xff] }
 0x42d   :  { %v3028_v39 = vpack.c.bf16 %v2524_v36, %v2523_v35 }
 0x435   :  { %v3127_v37 = vpop.eup %3126 }
 0x436   :  { %v3129_v40 = vpop.eup %3128  ;;  %v440_v43 = vmul.f32 %v3127_v37, %v3123_v28  ;;  %v3036_v28 = vpack.c.bf16 %v2530_v27, %v2529_v26  ;;  %v2548_v26 = vld [vmem:[%s3641_s1 + $0xe0] sm:$0xff]  ;;  %v2549_v27 = vld [vmem:[%s3641_s1 + $0xe8] sm:$0xff] }
 0x437   :  { %v438_v42 = vmul.f32 %v3129_v40, %v3125_v29  ;;  %v522_v29 = vld [vmem:[%s3642_s2] sm:$0xff] }
 0x439   :  { %2754 = vmatprep.mubr.msk.f32.mxu0 %vm418_vm3, %v438_v42 }
 0x43a   :  { %2755 = vmatmul.mubr.msk.f32.vlgmr.msra.gmra.mrb[2].mxu0 %vm418_vm3, %v440_v43 }
 0x43b   :  { %2993 = vmatpush3.bf16.msra.mxu0 %v2990_v34  ;;  %2776 = vmatprep.mubr.msk.f32.mxu0 %vm41_vm0, %v3293_v41  ;;  %v3024_v34 = vpack.c.bf16 %v2522_v31, %v2521_v30  ;;  %v2551_v30 = vld [vmem:[%s3641_s1 + $0xf8] sm:$0xff] }
 0x43c   :  { %2995 = vmatprep.subr.bf16.mxu0 %v2994_v44 }
 0x43f   :  { %2997 = vmatpush3.bf16.msra.mxu0 %v2994_v44 }
 0x442   :  { %2777 = vmatmul.mubr.msk.f32.vlgmr.msra.gmra.mrb[4].mxu0 %vm41_vm0, %v3305_v46 }
 0x443   :  { %2794 = vmatprep.mubr.msk.f32.mxu0 %vm326_vm1, %v594_v18  ;;  %v2518_v18 = vld [vmem:[%s3641_s1 + $0x58] sm:$0xff] }
 0x50d   :  { %v3394_v45 = vpop.f32.mrb[2].mxu0 }
 0x50e   :  { %v3396_v47 = vpop.f32.mrb[3].mxu0 }
 0x515   :  { %v2778_v48 = vpop.f32.mrb[4].mxu0 }
 0x516   :  { %v674_v49 = vpop.f32.mrb[5].mxu0 }
 0x517   :  { %v3006_v50 = vpack.c.bf16 %v2778_v48, %v674_v49 }
 0x519   :  { %3008 = vmatprep.subr.msk.bf16.mxu0 %vm3324_vm2, %v3006_v50 }
 0x51a   :  { %3011 = vmatpush3.bf16.xpose.msk.msra.mxu0 %vm3324_vm2, %v3006_v50 }
 0x51b   :  { %2804 = vmatprep.subr.mxu0 %v2510_v13 }
 0x521   :  { %2795 = vmatmul.mubr.msk.f32.vlgmr.msra.gmra.mrb[6].mxu0 %vm326_vm1, %v2767_v17  ;;  %v2517_v17 = vld [vmem:[%s3641_s1 + $0x50] sm:$0xff] }
 0x522   :  { %2805 = vmatpush3.msra.mxu0 %v2510_v13  ;;  %v3020_v22 = vpack.c.bf16 %v2518_v18, %v2517_v17 }
 0x523   :  { %2809 = vmatprep.subr.mxu0 %v522_v29 }
 0x5f4   :  { %v2796_v51 = vpop.f32.mrb[6].mxu0 }
 0x5f5   :  { %v851_v52 = vmul.f32 0.35355338, %v2796_v51  ;;  %v841_v53 = vpop.f32.mrb[7].mxu0 }
 0x5f6   :  { %v850_v54 = vmul.f32 0.35355338, %v841_v53 }
 0x5f7   :  { %v853_v55 = vadd.f32 %v851_v52, %v3362_v8 }
 0x5f8   :  { %v852_v56 = vadd.f32 %v850_v54, %v3367_v11 }
 0x5f9   :  { %v857_v58 = vsel %vm418_vm3, %v853_v55, -inf }
 0x5fa   :  { %858 = vmax.xlane.f32.xlu1 %v857_v58  ;;  %v854_v59 = vsel %vm418_vm3, %v852_v56, -inf }
 0x5fb   :  { %855 = vmax.xlane.f32.xlu0 %v854_v59 }
 0x687   :  { %v859_v60 = vpop.xlane.xlu1 %858 }
 0x688   :  { %v861_v61 = vsub.f32 %v853_v55, %v859_v60  ;;  %v856_v62 = vpop.xlane.xlu0 %855 }
 0x689   :  { %v860_v63 = vsub.f32 %v852_v56, %v856_v62 }
 0x68a   :  { %v864_v2 = vmul.f32 1.442695, %v861_v61 }
 0x68b   :  { %v862_v3 = vmul.f32 1.442695, %v860_v63 }
 0x68c   :  { %3130 = vpow2.f32 %v864_v2 }
 0x68d   :  { %3132 = vpow2.f32 %v862_v3 }
 0x696   :  { %v3131_v4 = vpop.eup %3130 }
 0x697   :  { %v3133_v5 = vpop.eup %3132  ;;  %v869_v6 = vsel %vm418_vm3, %v3131_v4, 0.0 }
 0x698   :  { %870 = vadd.xlane.f32.xlu1 %v869_v6  ;;  %v866_v7 = vsel %vm418_vm3, %v3133_v5, 0.0  ;;  %v2543_v6 = vld [vmem:[%s3641_s1 + $0x68] sm:$0xff] }
 0x699   :  { %867 = vadd.xlane.f32.xlu0 %v866_v7 }
 0x725   :  { %v871_v14 = vpop.xlane.xlu1 %870 }
 0x726   :  { %3134 = vrcp.f32 %v871_v14  ;;  %v868_v15 = vpop.xlane.xlu0 %867  ;;  %v2544_v14 = vld [vmem:[%s3641_s1 + $0x70] sm:$0xff] }
 0x727   :  { %3136 = vrcp.f32 %v868_v15  ;;  %v2545_v15 = vld [vmem:[%s3641_s1 + $0x78] sm:$0xff] }
 0x730   :  { %v3135_v16 = vpop.eup %3134 }
 0x731   :  { %v3137_v19 = vpop.eup %3136  ;;  %v875_v21 = vmul.f32 %v3135_v16, %v3131_v4 }
 0x732   :  { %v873_v20 = vmul.f32 %v3137_v19, %v3133_v5  ;;  %v2542_v5 = vld [vmem:[%s3641_s1 + $0x60] sm:$0xff]  ;;  %v3054_v19 = vpack.c.bf16 %v2545_v15, %v2544_v14 }
 0x733   :  { %v3050_v7 = vpack.c.bf16 %v2543_v6, %v2542_v5  ;;  %v2569_v5 = vld [vmem:[%s3645_s5 + $0x4] ss:$0 sm:$0xff] }
 0x734   :  { %2801 = vmatprep.mubr.msk.f32.mxu1 %vm418_vm3, %v873_v20  ;;  %v2554_v20 = vld [vmem:[%s3641_s1 + $0x160] sm:$0xff] }
 0x735   :  { %2802 = vmatmul.mubr.msk.f32.vlgmr.msra.gmra.mrb[10].mxu1 %vm418_vm3, %v875_v21  ;;  %v2555_v21 = vld [vmem:[%s3641_s1 + $0x168] sm:$0xff] }
 0x736   :  { %3019 = vmatpush3.bf16.msra.mxu1 %v3016_v12  ;;  %2822 = vmatprep.mubr.msk.f32.mxu1 %vm41_vm0, %v3293_v41 }
 0x737   :  { %3021 = vmatprep.subr.bf16.mxu1 %v3020_v22 }
 0x73a   :  { %3023 = vmatpush3.bf16.msra.mxu1 %v3020_v22  ;;  %v3066_v22 = vpack.c.bf16 %v2555_v21, %v2554_v20 }
 0x73b   :  { %3033 = vmatprep.subr.bf16.mxu1 %v3032_v25 }
 0x73d   :  { %2823 = vmatmul.mubr.msk.f32.vlgmr.msra.gmra.mrb[12].mxu1 %vm41_vm0, %v3305_v46 }
 0x73e   :  { %3035 = vmatpush3.bf16.msra.mxu1 %v3032_v25  ;;  %2844 = vmatprep.mubr.msk.f32.mxu1 %vm41_vm0, %v3293_v41  ;;  %v3070_v25 = vpack.c.bf16 %v2557_v24, %v2556_v23  ;;  %v2205_v24 = vld [vmem:[%s3643_s3] sm:$0xff] }
 0x73f   :  { %3037 = vmatprep.subr.bf16.mxu1 %v3036_v28 }
 0x742   :  { %3039 = vmatpush3.bf16.msra.mxu1 %v3036_v28  ;;  %v3058_v28 = vpack.c.bf16 %v2549_v27, %v2548_v26  ;;  %v2207_v27 = vld [vmem:[%s3643_s3 + $0x10] sm:$0xff] }
 0x745   :  { %2845 = vmatmul.mubr.msk.f32.vlgmr.msra.gmra.mrb[14].mxu1 %vm41_vm0, %v3305_v46 }
 0x808   :  { %v2803_v32 = vpop.f32.mrb[10].mxu1 }
 0x809   :  { %v948_v33 = vpop.f32.mrb[11].mxu1 }
 0x80a   :  { %2806 = vmatprep.mubr.msk.f32.mxu0 %vm326_vm1, %v948_v33 }
 0x80b   :  { %2807 = vmatmul.mubr.msk.f32.vlgmr.msra.gmra.mrb[8].mxu0 %vm326_vm1, %v2803_v32 }
 0x80c   :  { %2810 = vmatpush3.msra.mxu0 %v522_v29  ;;  %2811 = vmatprep.mubr.msk.f32.mxu0 %vm326_vm1, %v3396_v47  ;;  %v2550_v29 = vld [vmem:[%s3641_s1 + $0xf0] sm:$0xff] }
 0x80d   :  { %3025 = vmatprep.subr.bf16.mxu0 %v3024_v34  ;;  %v3062_v33 = vpack.c.bf16 %v2551_v30, %v2550_v29 }
 0x810   :  { %v2824_v37 = vpop.f32.mrb[12].mxu1 }
 0x811   :  { %v1192_v38 = vpop.f32.mrb[13].mxu1 }
 0x813   :  { %2812 = vmatmul.mubr.msk.f32.vlgmr.msra.gmra.mrb[8].mxu0 %vm326_vm1, %v3394_v45 }
 0x814   :  { %3027 = vmatpush3.bf16.msra.mxu0 %v3024_v34  ;;  %2833 = vmatprep.mubr.msk.f32.mxu0 %vm41_vm0, %v3293_v41 }
 0x815   :  { %3029 = vmatprep.subr.bf16.mxu0 %v3028_v39 }
 0x818   :  { %3031 = vmatpush3.bf16.msra.mxu0 %v3028_v39  ;;  %v2846_v40 = vpop.f32.mrb[14].mxu1 }
 0x819   :  { %v1352_v42 = vpop.f32.mrb[15].mxu1 }
 0x81a   :  { %v3046_v43 = vpack.c.bf16 %v2846_v40, %v1352_v42 }
 0x81b   :  { %2834 = vmatmul.mubr.msk.f32.vlgmr.msra.gmra.mrb[10].mxu0 %vm41_vm0, %v3305_v46 }
 0x81c   :  { %2851 = vmatprep.mubr.msk.f32.mxu0 %vm326_vm1, %v1192_v38  ;;  %3047 = vmatprep.subr.bf16.mxu1 %v3046_v43 }
 0x81d   :  { %3049 = vmatpush3.bf16.msra.mxu1 %v3046_v43 }
 0x81e   :  { %3051 = vmatprep.subr.bf16.mxu1 %v3050_v7 }
 0x8ee   :  { %v2835_v44 = vpop.f32.mrb[10].mxu0 }
 0x8ef   :  { %v1272_v47 = vpop.f32.mrb[11].mxu0 }
 0x8f0   :  { %v3040_v48 = vpack.c.bf16 %v2835_v44, %v1272_v47 }
 0x8f2   :  { %3042 = vmatprep.subr.msk.bf16.mxu0 %vm3324_vm2, %v3040_v48 }
 0x8f3   :  { %3045 = vmatpush3.bf16.xpose.msk.msra.mxu0 %vm3324_vm2, %v3040_v48 }
 0x8f4   :  { %2861 = vmatprep.subr.mxu0 %v2539_v9 }
 0x8fa   :  { %2852 = vmatmul.mubr.msk.f32.vlgmr.msra.gmra.mrb[12].mxu0 %vm326_vm1, %v2824_v37 }
 0x8fb   :  { %2862 = vmatpush3.msra.mxu0 %v2539_v9 }
 0x8fc   :  { %3059 = vmatprep.subr.bf16.mxu0 %v3058_v28 }
 0x9cd   :  { %v2853_v45 = vpop.f32.mrb[12].mxu0 }
 0x9ce   :  { %v1449_v49 = vmul.f32 0.35355338, %v2853_v45  ;;  %v1439_v50 = vpop.f32.mrb[13].mxu0 }
 0x9cf   :  { %v1448_v51 = vmul.f32 0.35355338, %v1439_v50 }
 0x9d0   :  { %v1451_v52 = vadd.f32 %v1449_v49, %v3362_v8 }
 0x9d1   :  { %v1450_v53 = vadd.f32 %v1448_v51, %v3367_v11 }
 0x9d2   :  { %v1455_v54 = vsel %vm418_vm3, %v1451_v52, -inf }
 0x9d3   :  { %1456 = vmax.xlane.f32.xlu1 %v1455_v54  ;;  %v1452_v55 = vsel %vm418_vm3, %v1450_v53, -inf }
 0x9d4   :  { %1453 = vmax.xlane.f32.xlu0 %v1452_v55 }
 0xa60   :  { %v1457_v56 = vpop.xlane.xlu1 %1456 }
 0xa61   :  { %v1459_v58 = vsub.f32 %v1451_v52, %v1457_v56  ;;  %v1454_v59 = vpop.xlane.xlu0 %1453 }
 0xa62   :  { %v1458_v60 = vsub.f32 %v1450_v53, %v1454_v59 }
 0xa63   :  { %v1462_v61 = vmul.f32 1.442695, %v1459_v58  ;;  %v2566_v58 = vld [vmem:[%s3642_s2 + $0x18] sm:$0xff] }
 0xa64   :  { %v1460_v62 = vmul.f32 1.442695, %v1458_v60 }
 0xa65   :  { %3138 = vpow2.f32 %v1462_v61 }
 0xa66   :  { %3140 = vpow2.f32 %v1460_v62 }
 0xa6f   :  { %v3139_v63 = vpop.eup %3138 }
 0xa70   :  { %v3141_v2 = vpop.eup %3140  ;;  %v1467_v3 = vsel %vm418_vm3, %v3139_v63, 0.0 }
 0xa71   :  { %1468 = vadd.xlane.f32.xlu1 %v1467_v3  ;;  %v1464_v4 = vsel %vm418_vm3, %v3141_v2, 0.0 }
 0xa72   :  { %1465 = vadd.xlane.f32.xlu0 %v1464_v4 }
 0xafe   :  { %v1469_v10 = vpop.xlane.xlu1 %1468 }
 0xaff   :  { %3142 = vrcp.f32 %v1469_v10  ;;  %v1466_v12 = vpop.xlane.xlu0 %1465 }
 0xb00   :  { %3144 = vrcp.f32 %v1466_v12 }
 0xb09   :  { %v3143_v13 = vpop.eup %3142 }
 0xb0a   :  { %v3145_v16 = vpop.eup %3144  ;;  %v1473_v18 = vmul.f32 %v3143_v13, %v3139_v63 }
 0xb0b   :  { %v1471_v17 = vmul.f32 %v3145_v16, %v3141_v2 }
 0xb0d   :  { %2858 = vmatprep.mubr.msk.f32.mxu1 %vm418_vm3, %v1471_v17 }
 0xb0e   :  { %2859 = vmatmul.mubr.msk.f32.vlgmr.msra.gmra.mrb[16].mxu1 %vm418_vm3, %v1473_v18 }
 0xb0f   :  { %3053 = vmatpush3.bf16.msra.mxu1 %v3050_v7  ;;  %2874 = vmatprep.mubr.msk.f32.mxu1 %vm41_vm0, %v3293_v41 }
 0xb10   :  { %3055 = vmatprep.subr.bf16.mxu1 %v3054_v19 }
 0xb13   :  { %3057 = vmatpush3.bf16.msra.mxu1 %v3054_v19 }
 0xb14   :  { %3067 = vmatprep.subr.bf16.mxu1 %v3066_v22 }
 0xb16   :  { %2875 = vmatmul.mubr.msk.f32.vlgmr.msra.gmra.mrb[18].mxu1 %vm41_vm0, %v3305_v46 }
 0xb17   :  { %3069 = vmatpush3.bf16.msra.mxu1 %v3066_v22  ;;  %2896 = vmatprep.mubr.msk.f32.mxu1 %vm41_vm0, %v3293_v41 }
 0xb18   :  { %3071 = vmatprep.subr.bf16.mxu1 %v3070_v25 }
 0xb1b   :  { %3073 = vmatpush3.bf16.msra.mxu1 %v3070_v25  ;;  %v2206_v25 = vld [vmem:[%s3643_s3 + $0x8] sm:$0xff] }
 0xb1c   :  { %v3084_v26 = vpack.c.bf16 %v2206_v25, %v2205_v24 }
 0xb1e   :  { %2897 = vmatmul.mubr.msk.f32.vlgmr.msra.gmra.mrb[20].mxu1 %vm41_vm0, %v3305_v46 }
 0xbe1   :  { %v2860_v31 = vpop.f32.mrb[16].mxu1 }
 0xbe2   :  { %v1546_v32 = vpop.f32.mrb[17].mxu1 }
 0xbe3   :  { %2863 = vmatprep.mubr.msk.f32.mxu0 %vm326_vm1, %v1546_v32 }
 0xbe4   :  { %2864 = vmatmul.mubr.msk.f32.vlgmr.msra.gmra.mrb[8].mxu0 %vm326_vm1, %v2860_v31 }
 0xbe5   :  { %3061 = vmatpush3.bf16.msra.mxu0 %v3058_v28  ;;  %2885 = vmatprep.mubr.msk.f32.mxu0 %vm41_vm0, %v3293_v41  ;;  %v2208_v28 = vld [vmem:[%s3643_s3 + $0x18] sm:$0xff] }
 0xbe6   :  { %3063 = vmatprep.subr.bf16.mxu0 %v3062_v33  ;;  %v3088_v29 = vpack.c.bf16 %v2208_v28, %v2207_v27 }
 0xbe9   :  { %v2876_v34 = vpop.f32.mrb[18].mxu1  ;;  %3065 = vmatpush3.bf16.msra.mxu0 %v3062_v33 }
 0xbea   :  { %v1711_v35 = vpop.f32.mrb[19].mxu1 }
 0xbec   :  { %2886 = vmatmul.mubr.msk.f32.vlgmr.msra.gmra.mrb[14].mxu0 %vm41_vm0, %v3305_v46 }
 0xbed   :  { %2903 = vmatprep.mubr.msk.f32.mxu0 %vm326_vm1, %v1711_v35 }
 0xbf1   :  { %v2898_v36 = vpop.f32.mrb[20].mxu1 }
 0xbf2   :  { %v1871_v37 = vpop.f32.mrb[21].mxu1 }
 0xbf3   :  { %v3080_v38 = vpack.c.bf16 %v2898_v36, %v1871_v37  ;;  %v2570_v37 = vld [vmem:[%s3645_s5 + $0x2] ss:$0 sm:$0xff] }
 0xbf5   :  { %3081 = vmatprep.subr.bf16.mxu1 %v3080_v38 }
 0xbf6   :  { %3083 = vmatpush3.bf16.msra.mxu1 %v3080_v38 }
 0xbf7   :  { %3085 = vmatprep.subr.bf16.mxu1 %v3084_v26 }
 0xcbf   :  { %v2887_v39 = vpop.f32.mrb[14].mxu0 }
 0xcc0   :  { %v1791_v40 = vpop.f32.mrb[15].mxu0 }
 0xcc1   :  { %v3074_v42 = vpack.c.bf16 %v2887_v39, %v1791_v40 }
 0xcc3   :  { %3076 = vmatprep.subr.msk.bf16.mxu0 %vm3324_vm2, %v3074_v42 }
 0xcc4   :  { %3079 = vmatpush3.bf16.xpose.msk.msra.mxu0 %vm3324_vm2, %v3074_v42  ;;  %v2571_v42 = vld [vmem:[%s3645_s5 + $0x3] ss:$0 sm:$0xff] }
 0xcc5   :  { %2913 = vmatprep.subr.mxu0 %v2566_v58 }
 0xccb   :  { %2904 = vmatmul.mubr.msk.f32.vlgmr.msra.gmra.mrb[16].mxu0 %vm326_vm1, %v2876_v34 }
 0xccc   :  { %2914 = vmatpush3.msra.mxu0 %v2566_v58 }
 0xd9e   :  { %v2905_v41 = vpop.f32.mrb[16].mxu0 }
 0xd9f   :  { %v1968_v46 = vmul.f32 0.35355338, %v2905_v41  ;;  %v1958_v43 = vpop.f32.mrb[17].mxu0 }
 0xda0   :  { %v1967_v44 = vmul.f32 0.35355338, %v1958_v43 }
 0xda1   :  { %v1970_v47 = vadd.f32 %v1968_v46, %v3362_v8 }
 0xda2   :  { %v1969_v48 = vadd.f32 %v1967_v44, %v3367_v11 }
 0xda3   :  { %v1974_v45 = vsel %vm418_vm3, %v1970_v47, -inf }
 0xda4   :  { %1975 = vmax.xlane.f32.xlu1 %v1974_v45  ;;  %v1971_v49 = vsel %vm418_vm3, %v1969_v48, -inf }
 0xda5   :  { %1972 = vmax.xlane.f32.xlu0 %v1971_v49  ;;  %v2352_v49 = vld [vmem:[%s3644_s4 + $0x10] sm:$0xff] }
 0xe31   :  { %v1976_v50 = vpop.xlane.xlu1 %1975 }
 0xe32   :  { %v1978_v51 = vsub.f32 %v1970_v47, %v1976_v50  ;;  %v1973_v57 = vpop.xlane.xlu0 %1972  ;;  %v2350_v47 = vld [vmem:[%s3644_s4] sm:$0xff]  ;;  %v2353_v50 = vld [vmem:[%s3644_s4 + $0x18] sm:$0xff] }
 0xe33   :  { %v1977_v52 = vsub.f32 %v1969_v48, %v1973_v57  ;;  %v2351_v48 = vld [vmem:[%s3644_s4 + $0x8] sm:$0xff]  ;;  %v2354_v57 = vld [vmem:[%s3644_s4 + $0x20] sm:$0xff] }
 0xe34   :  { %v1981_v53 = vmul.f32 1.442695, %v1978_v51  ;;  %v3092_v45 = vpack.c.bf16 %v2351_v48, %v2350_v47  ;;  %v3096_v51 = vpack.c.bf16 %v2353_v50, %v2352_v49 }
 0xe35   :  { %v1979_v54 = vmul.f32 1.442695, %v1977_v52  ;;  %v2355_v52 = vld [vmem:[%s3644_s4 + $0x28] sm:$0xff] }
 0xe36   :  { %3146 = vpow2.f32 %v1981_v53  ;;  %3093 = vmatprep.subr.bf16.mxu0 %v3092_v45  ;;  %v3100_v53 = vpack.c.bf16 %v2355_v52, %v2354_v57  ;;  %v2575_v57 = vld [vmem:[%s3645_s5 + $0x5] ss:$0 sm:$0xff] }
 0xe37   :  { %3148 = vpow2.f32 %v1979_v54  ;;  %v2356_v54 = vld [vmem:[%s3644_s4 + $0x30] sm:$0xff] }
 0xe40   :  { %v3147_v55 = vpop.eup %3146 }
 0xe41   :  { %v3149_v56 = vpop.eup %3148  ;;  %v1986_v8 = vsel %vm418_vm3, %v3147_v55, 0.0 }
 0xe42   :  { %1987 = vadd.xlane.f32.xlu1 %v1986_v8  ;;  %v1983_v11 = vsel %vm418_vm3, %v3149_v56, 0.0  ;;  %v2572_v8 = vld [vmem:[%s3646_s6] ss:$0 sm:$0xff] }
 0xe43   :  { %1984 = vadd.xlane.f32.xlu0 %v1983_v11 }
 0xecf   :  { %v1988_v59 = vpop.xlane.xlu1 %1987 }
 0xed0   :  { %3150 = vrcp.f32 %v1988_v59  ;;  %v1985_v60 = vpop.xlane.xlu0 %1984 }
 0xed1   :  { %3152 = vrcp.f32 %v1985_v60 }
 0xeda   :  { %v3151_v61 = vpop.eup %3150 }
 0xedb   :  { %v3153_v62 = vpop.eup %3152  ;;  %v1992_v2 = vmul.f32 %v3151_v61, %v3147_v55  ;;  %v2357_v55 = vld [vmem:[%s3644_s4 + $0x38] sm:$0xff] }
 0xedc   :  { %v1990_v63 = vmul.f32 %v3153_v62, %v3149_v56  ;;  %v3104_v56 = vpack.c.bf16 %v2357_v55, %v2356_v54 }
 0xede   :  { %2910 = vmatprep.mubr.msk.f32.mxu1 %vm418_vm3, %v1990_v63 }
 0xedf   :  { %2911 = vmatmul.mubr.msk.f32.vlgmr.msra.gmra.mrb[22].mxu1 %vm418_vm3, %v1992_v2 }
 0xee0   :  { %3087 = vmatpush3.bf16.msra.mxu1 %v3084_v26 }
 0xee1   :  { %3089 = vmatprep.subr.bf16.mxu1 %v3088_v29 }
 0xee4   :  { %3091 = vmatpush3.bf16.msra.mxu1 %v3088_v29 }
 0xfb2   :  { %v2912_v3 = vpop.f32.mrb[22].mxu1 }
 0xfb3   :  { %v2065_v4 = vpop.f32.mrb[23].mxu1 }
 0xfb4   :  { %2915 = vmatprep.mubr.msk.f32.mxu0 %vm326_vm1, %v2065_v4 }
 0xfb5   :  { %2916 = vmatmul.mubr.msk.f32.vlgmr.msra.gmra.mrb[8].mxu0 %vm326_vm1, %v2912_v3 }
 0xfb6   :  { %3095 = vmatpush3.bf16.msra.mxu0 %v3092_v45 }
 0xfb7   :  { %3097 = vmatprep.subr.bf16.mxu0 %v3096_v51 }
 0xfba   :  { %3099 = vmatpush3.bf16.msra.mxu0 %v3096_v51 }
 0xfbb   :  { %3101 = vmatprep.subr.bf16.mxu0 %v3100_v53 }
 0xfbe   :  { %3103 = vmatpush3.bf16.msra.mxu0 %v3100_v53 }
 0xfbf   :  { %3105 = vmatprep.subr.bf16.mxu0 %v3104_v56 }
 0xfc2   :  { %3107 = vmatpush3.bf16.msra.mxu0 %v3104_v56 }
0x1088   :  { %v2917_v6 = vpop.f32.mrb[8].mxu0 }
0x1089   :  { %v2160_v7 = vadd.f32 %v2917_v6, %v3247_v1  ;;  %v2148_v9 = vpop.f32.mrb[9].mxu0 }
0x108a   :  { %v2159_v10 = vadd.f32 %v2148_v9, %v3242_v0 }
0x108b   :  { %v3562_v12 = vadd.f32 %v2569_v5, %v2160_v7 }
0x108c   :  { %v3564_v13 = vadd.f32 %v2569_v5, %v2159_v10 }
0x108d   :  { %v2170_v14 = vsel %vm41_vm0, %v3562_v12, 0.0 }
0x108e   :  { %2171 = vadd.xlane.f32.xlu1 %v2170_v14  ;;  %v2167_v15 = vsel %vm41_vm0, %v3564_v13, 0.0 }
0x108f   :  { %2168 = vadd.xlane.f32.xlu0 %v2167_v15 }
0x111b   :  { %v2172_v16 = vpop.xlane.xlu1 %2171 }
0x111c   :  { %v2174_v17 = vmul.f32 0.03125, %v2172_v16  ;;  %v2169_v18 = vpop.xlane.xlu0 %2168 }
0x111d   :  { %v2173_v19 = vmul.f32 0.03125, %v2169_v18 }
0x111e   :  { %v2176_v1 = vsub.f32 %v3562_v12, %v2174_v17 }
0x111f   :  { %v2175_v0 = vsub.f32 %v3564_v13, %v2173_v19 }
0x1120   :  { %v2178_v20 = vmul.f32 %v2176_v1, %v2176_v1 }
0x1121   :  { %v2177_v21 = vmul.f32 %v2175_v0, %v2175_v0 }
0x1122   :  { %v2182_v22 = vsel %vm41_vm0, %v2178_v20, 0.0 }
0x1123   :  { %2183 = vadd.xlane.f32.xlu1 %v2182_v22  ;;  %v2179_v23 = vsel %vm41_vm0, %v2177_v21, 0.0 }
0x1124   :  { %2180 = vadd.xlane.f32.xlu0 %v2179_v23 }
0x11b0   :  { %v2184_v30 = vpop.xlane.xlu1 %2183 }
0x11b1   :  { %v2186_v31 = vmul.f32 0.03125, %v2184_v30  ;;  %v2181_v32 = vpop.xlane.xlu0 %2180 }
0x11b2   :  { %v2185_v33 = vmul.f32 0.03125, %v2181_v32 }
0x11b3   :  { %v2188_v34 = vadd.f32 1e-05, %v2186_v31 }
0x11b4   :  { %v2187_v35 = vadd.f32 1e-05, %v2185_v33 }
0x11b5   :  { %3154 = vrsqrt.f32 %v2188_v34 }
0x11b6   :  { %3156 = vrsqrt.f32 %v2187_v35 }
0x11bf   :  { %v3155_v36 = vpop.eup %3154 }
0x11c0   :  { %v3157_v38 = vpop.eup %3156  ;;  %v2192_v39 = vmul.f32 %v3155_v36, %v2176_v1 }
0x11c1   :  { %v2191_v40 = vmul.f32 %v3157_v38, %v2175_v0 }
0x11c2   :  { %v2198_v41 = vmul.f32 %v2570_v37, %v2192_v39 }
0x11c3   :  { %v2197_v46 = vmul.f32 %v2570_v37, %v2191_v40  ;;  %v3190_v40 = vmov -1.0  }
0x11c4   :  { %v2204_v44 = vadd.f32 %v2571_v42, %v2198_v41 }
0x11c5   :  { %v2203_v43 = vadd.f32 %v2571_v42, %v2197_v46 }
0x11c7   :  { %2926 = vmatprep.mubr.msk.f32.mxu1 %vm41_vm0, %v2203_v43 }
0x11c8   :  { %2927 = vmatmul.mubr.msk.f32.vlgmr.msra.gmra.mrb[24].mxu1 %vm41_vm0, %v2204_v44 }
0x129b   :  { %v2928_v11 = vpop.f32.mrb[24].mxu1 }
0x129c   :  { %v2293_v58 = vadd.f32 %v2928_v11, %v2572_v8  ;;  %v2287_v59 = vpop.f32.mrb[25].mxu1 }
0x129d   :  { %v2288_v60 = vadd.f32 %v2572_v8, %v2287_v59 }
0x129e   :  { %v2299_v61 = vmul.f32 0.70710677, %v2293_v58  ;;  %v2297_v49 = vmul.f32 0.5, %v2293_v58 }
0x129f   :  { %v2298_v62 = vmul.f32 0.70710677, %v2288_v60  ;;  %v2296_v48 = vmul.f32 0.5, %v2288_v60 }
0x12a0   :  { %v2305_v63 = vand.u32 2147483647, %v2299_v61  ;;  %vm2301_vm4 = vcmp.ge.f32.partialorder %v2299_v61, 0.0 }
0x12a1   :  { %v2304_v2 = vand.u32 2147483647, %v2298_v62  ;;  %vm2300_vm5 = vcmp.ge.f32.partialorder %v2298_v62, 0.0  ;;  %v2303_v42 = vsel %vm2301_vm4, 1.0, %v3190_v40 }
0x12a2   :  { %v2307_v3 = vmul.f32 0.3275911, %v2305_v63  ;;  %v2333_v7 = vsub.f32 0.0, %v2305_v63  ;;  %v2302_v43 = vsel %vm2300_vm5, 1.0, %v3190_v40 }
0x12a3   :  { %v2306_v4 = vmul.f32 0.3275911, %v2304_v2  ;;  %v2332_v9 = vsub.f32 0.0, %v2304_v2 }
0x12a4   :  { %v2309_v5 = vadd.f32 1.0, %v2307_v3  ;;  %v2335_v14 = vmul.f32 %v2333_v7, %v2305_v63 }
0x12a5   :  { %v2308_v6 = vadd.f32 1.0, %v2306_v4  ;;  %v2334_v17 = vmul.f32 %v2332_v9, %v2304_v2 }
0x12a6   :  { %3158 = vrcp.f32 %v2309_v5  ;;  %v2338_v1 = vmul.f32 1.442695, %v2335_v14 }
0x12a7   :  { %3160 = vrcp.f32 %v2308_v6  ;;  %v2336_v21 = vmul.f32 1.442695, %v2334_v17 }
0x12a8   :  { %3162 = vpow2.f32 %v2338_v1 }
0x12a9   :  { %3164 = vpow2.f32 %v2336_v21 }
0x12b0   :  { %v3159_v10 = vpop.eup %3158 }
0x12b1   :  { %v3161_v15 = vpop.eup %3160  ;;  %v2315_v16 = vmul.f32 1.0614054, %v3159_v10 }
0x12b2   :  { %v2314_v18 = vmul.f32 1.0614054, %v3161_v15  ;;  %v3163_v34 = vpop.eup %3162 }
0x12b3   :  { %v2317_v19 = vadd.f32 -1.4531521, %v2315_v16  ;;  %v3165_v36 = vpop.eup %3164 }
0x12b4   :  { %v2316_v0 = vadd.f32 -1.4531521, %v2314_v18 }
0x12b5   :  { %v2319_v20 = vmul.f32 %v3159_v10, %v2317_v19 }
0x12b6   :  { %v2318_v22 = vmul.f32 %v3161_v15, %v2316_v0 }
0x12b7   :  { %v2321_v23 = vadd.f32 1.4214138, %v2319_v20 }
0x12b8   :  { %v2320_v24 = vadd.f32 1.4214138, %v2318_v22 }
0x12b9   :  { %v2323_v25 = vmul.f32 %v3159_v10, %v2321_v23 }
0x12ba   :  { %v2322_v26 = vmul.f32 %v3161_v15, %v2320_v24 }
0x12bb   :  { %v2325_v27 = vadd.f32 -0.28449672, %v2323_v25 }
0x12bc   :  { %v2324_v28 = vadd.f32 -0.28449672, %v2322_v26 }
0x12bd   :  { %v2327_v29 = vmul.f32 %v3159_v10, %v2325_v27 }
0x12be   :  { %v2326_v30 = vmul.f32 %v3161_v15, %v2324_v28 }
0x12bf   :  { %v2329_v31 = vadd.f32 0.2548296, %v2327_v29 }
0x12c0   :  { %v2328_v32 = vadd.f32 0.2548296, %v2326_v30 }
0x12c1   :  { %v2331_v33 = vmul.f32 %v3159_v10, %v2329_v31 }
0x12c2   :  { %v2330_v35 = vmul.f32 %v3161_v15, %v2328_v32 }
0x12c3   :  { %v2341_v37 = vmul.f32 %v3163_v34, %v2331_v33 }
0x12c4   :  { %v2340_v38 = vmul.f32 %v3165_v36, %v2330_v35 }
0x12c5   :  { %v2343_v39 = vsub.f32 1.0, %v2341_v37 }
0x12c6   :  { %v2342_v41 = vsub.f32 1.0, %v2340_v38 }
0x12c7   :  { %v2345_v46 = vmul.f32 %v2343_v39, %v2303_v42 }
0x12c8   :  { %v2344_v44 = vmul.f32 %v2342_v41, %v2302_v43 }
0x12c9   :  { %v2347_v47 = vadd.f32 1.0, %v2345_v46 }
0x12ca   :  { %v2346_v45 = vadd.f32 1.0, %v2344_v44 }
0x12cb   :  { %v2349_v51 = vmul.f32 %v2347_v47, %v2297_v49 }
0x12cc   :  { %v2348_v50 = vmul.f32 %v2346_v45, %v2296_v48 }
0x12ce   :  { %2945 = vmatprep.mubr.msk.f32.mxu0 %vm2362_vm6, %v2348_v50 }
0x12cf   :  { %2946 = vmatmul.mubr.msk.f32.vlgmr.msra.gmra.mrb[18].mxu0 %vm2362_vm6, %v2349_v51 }
0x13a2   :  { %v2947_v52 = vpop.f32.mrb[18].mxu0 }
0x13a3   :  { %v2441_v53 = vadd.f32 %v2947_v52, %v2575_v57  ;;  %v2435_v54 = vpop.f32.mrb[19].mxu0 }
0x13a4   :  { %v2436_v55 = vadd.f32 %v2575_v57, %v2435_v54 }
0x13a5   :  { %v2445_v56 = vadd.f32 %v2441_v53, %v3562_v12 }
0x13a6   :  { %v2444_v8 = vadd.f32 %v2436_v55, %v3564_v13 }
0x13a7   :  { %2447 = vst.msk [vmem:[#allocation2 + $0x8] sm:$0xff] %vm41_vm0, %v2445_v56 }
0x13a8   :  { %2446 = vst.msk [vmem:[#allocation2] sm:$0xff] %vm41_vm0, %v2444_v8 }
0x13a9   :  { %3177 = shalt.err (!%p3174_p4)
}
0x13aa   :  { %s3178_s9 = scalar_lea.hbm %s3648_s8, 256 }
0x13ab   :  { %p3179_p5 = scmp.ne.s32.totalorder %s3648_s8, %s3178_s9  ;;  %p3182_p6 = scmp.lt.u32.totalorder %s3178_s9, %s3648_s8 }
0x13ad   :  { %p3184_p7 = pnand %p3182_p6, %p3179_p5 }
0x13af   :  { %3187 = shalt.err (!%p3184_p7)
}
0x13b0   :  { %s3192_s12 = smov 128   ;;  %s3193_s13 = smov 8  }
0x13b1   :  { %2459 = dma.vmem_to_hbm [thread:$0]  %s2454_s29, 256, %s3648_s8, [#allocation3], %s3192_s12, %s3192_s12, %s3193_s13  }
0x13b2   :  { %3188 = dma.done.wait [#allocation3], 256  }
0x13b3   :  { %3189 = vsyncadd [#allocation3], 4294967040 }
0x13b4   :  { %2463 = vsyncpa [#allocation3], 1 }

</bundles_post_ra>
